<compile_context>
chip_gen: v7x
topology: tpu7x:2x2x1
jax: 0.10.0
libtpu: 0.0.40
codegen_flags: <defaults>
</compile_context>

<pallas_src>
import jax
import jax.numpy as jnp
from jax.experimental import pallas as pl
from jax.experimental.pallas import tpu as pltpu

D_K = D_V = 16
D_MODEL = 128
N_HEADS = 8
D_FF = 512
LN_EPS = 1e-5


def _layernorm(x, gamma, beta):
    mean = jnp.mean(x, axis=-1, keepdims=True)
    var = jnp.mean((x - mean) ** 2, axis=-1, keepdims=True)
    return (x - mean) * jax.lax.rsqrt(var + LN_EPS) * gamma + beta


def encoder_kernel(q_ref, k_ref, v_ref, mask_ref,
                   w_rq_ref, wk_ref, wv_ref, wo_ref,
                   w1_ref, w2_ref, ln_ref,
                   out_ref, attn_ref):
    TB, S, _ = mask_ref.shape
    rows = TB * S

    q2d = q_ref[...]            # (TB*S, D_MODEL) lane-dense slab
    k2d = k_ref[...]
    v2d = v_ref[...]
    mask = mask_ref[...]        # (TB, S, S) float32, 1.0 where masked

    # Fused residual|Q projection: one (TB*S,128)@(128,256) matmul; the result
    # slices are 128-lane aligned (free, tile-boundary aligned).
    rq = jnp.dot(q2d, w_rq_ref[...], preferred_element_type=jnp.float32)
    residual = rq[:, :D_MODEL]
    Qp = rq[:, D_MODEL:]
    Kp = jnp.dot(k2d, wk_ref[...], preferred_element_type=jnp.float32)
    Vp = jnp.dot(v2d, wv_ref[...], preferred_element_type=jnp.float32)

    # (TB*S, H*Dh) -> (TB*H, S, Dh): head-batched layout for one batched attention.
    def split_heads(x):
        x3 = x.reshape(TB, S, N_HEADS * D_K)
        heads = [x3[:, :, h * D_K:(h + 1) * D_K] for h in range(N_HEADS)]
        return jnp.stack(heads, axis=1).reshape(TB * N_HEADS, S, D_K)

    Qh = split_heads(Qp)
    Kh = split_heads(Kp)
    Vh = split_heads(Vp)

    scale = 1.0 / jnp.sqrt(jnp.float32(D_K))
    # One batched QK^T over all (batch, head) pairs.
    scores = jnp.einsum("bqd,bkd->bqk", Qh, Kh,
                        preferred_element_type=jnp.float32) * scale   # (TB*H, S, S)

    # Mask applied once for all heads (exact masked_fill semantics).
    mask_b = jnp.broadcast_to(mask[:, None, :, :],
                              (TB, N_HEADS, S, S)).reshape(TB * N_HEADS, S, S)
    scores = jnp.where(mask_b > 0.5, jnp.float32(-1e9), scores)

    # Single numerically-stable softmax over all (batch, head) rows.
    scores = scores - jnp.max(scores, axis=-1, keepdims=True)
    e = jnp.exp(scores)
    attn = e / jnp.sum(e, axis=-1, keepdims=True)                     # (TB*H, S, S)

    # Single store of the attention weights for the whole block.
    attn_ref[...] = attn.reshape(TB, N_HEADS, S, S)

    # One batched attn@V, then merge heads back onto lanes.
    ctx = jnp.einsum("bqk,bkd->bqd", attn, Vh,
                     preferred_element_type=jnp.float32)              # (TB*H, S, D_V)
    ctx4 = ctx.reshape(TB, N_HEADS, S, D_V)
    context = jnp.concatenate([ctx4[:, h] for h in range(N_HEADS)], axis=-1)
    context = context.reshape(rows, N_HEADS * D_V)

    ln = ln_ref[...]                                                  # (4, D_MODEL)
    mha = jnp.dot(context, wo_ref[...], preferred_element_type=jnp.float32)
    x1 = _layernorm(mha + residual, ln[0], ln[1])

    # Position-wise feed-forward on the full (TB*S, .) slab.
    h1 = jnp.maximum(jnp.dot(x1, w1_ref[...], preferred_element_type=jnp.float32), 0.0)
    ffn = jnp.dot(h1, w2_ref[...], preferred_element_type=jnp.float32)
    out_ref[...] = _layernorm(ffn + x1, ln[2], ln[3])


def _choose_tb(B, S, target_rows=128, max_rows=1024):
    """How many batch elements to fold into one grid step (fills MXU rows)."""
    divisors = [d for d in range(1, B + 1) if B % d == 0]
    # Block rows (d*S) must be a multiple of 8 (sublane tiling) unless the block
    # spans the whole flattened array (d == B).
    valid = [d for d in divisors if (d * S) % 8 == 0 or d == B]
    if not valid:
        return B
    meeting = [d for d in valid if target_rows <= d * S <= max_rows]
    if meeting:
        return min(meeting)   # fill MXU rows while keeping the most grid steps
    fitting = [d for d in valid if d * S <= max_rows]
    return max(fitting) if fitting else min(valid)


def inter_encoder_layer(inputs_Q, inputs_K, inputs_V, attn_mask, params):
    # Only the mask-present path of MultiHeadAttention.forward is implemented
    # (residual = fc0(input_Q)); this matches how the module is exercised here.
    (wfc0, wq, wk, wv, wo, ln1_g, ln1_b, w1, w2, ln2_g, ln2_b) = params
    B, S, _ = inputs_Q.shape
    TB = _choose_tb(B, S)
    rows = TB * S
    grid = (B // TB,)

    # Fold fc0|W_Q into one weight; pack LN params into one (4, d_model) tensor.
    w_rq = jnp.concatenate([wfc0, wq], axis=1)                        # (128, 256)
    ln_pack = jnp.concatenate([ln1_g, ln1_b, ln2_g, ln2_b], axis=0)   # (4, 128)

    # Present activations as lane-dense 2-D slabs (free XLA reshapes).
    q2d = inputs_Q.reshape(B * S, D_MODEL)
    k2d = inputs_K.reshape(B * S, D_MODEL)
    v2d = inputs_V.reshape(B * S, D_MODEL)
    mask_f = attn_mask.astype(jnp.float32)

    act_spec = pl.BlockSpec((rows, D_MODEL), lambda b: (b, 0))

    def full_spec(shape):
        return pl.BlockSpec(shape, lambda b, _nd=len(shape): (0,) * _nd)

    in_specs = [
        act_spec, act_spec, act_spec,
        pl.BlockSpec((TB, S, S), lambda b: (b, 0, 0)),
        full_spec((D_MODEL, 2 * D_MODEL)),   # fc0 | W_Q fused
        full_spec((D_MODEL, D_MODEL)),       # W_K
        full_spec((D_MODEL, D_MODEL)),       # W_V
        full_spec((D_MODEL, D_MODEL)),       # fc (output projection)
        full_spec((D_MODEL, D_FF)),          # FFN W1
        full_spec((D_FF, D_MODEL)),          # FFN W2
        full_spec((4, D_MODEL)),             # LN1/LN2 gamma+beta packed
    ]
    out_specs = [
        pl.BlockSpec((rows, D_MODEL), lambda b: (b, 0)),
        # TODO(synk): for very long S on v7x, tile the query axis (or emit bf16
        # attn) so the (TB, H, S, S) block stays within the 64 MiB VMEM budget.
        pl.BlockSpec((TB, N_HEADS, S, S), lambda b: (b, 0, 0, 0)),
    ]
    out_shape = [
        jax.ShapeDtypeStruct((B * S, D_MODEL), jnp.float32),
        jax.ShapeDtypeStruct((B, N_HEADS, S, S), jnp.float32),
    ]

    weight_elems = (D_MODEL * 2 * D_MODEL + 3 * D_MODEL * D_MODEL
                    + 2 * D_MODEL * D_FF + 4 * D_MODEL)
    flops = (2 * B * S * (D_MODEL * 2 * D_MODEL + 3 * D_MODEL * D_MODEL
                          + 2 * D_MODEL * D_FF)
             + 4 * B * N_HEADS * S * S * D_K)
    cost = pl.CostEstimate(
        flops=flops,
        transcendentals=B * N_HEADS * S * S + 4 * B * S,
        bytes_accessed=4 * (3 * B * S * D_MODEL + B * S * S + weight_elems
                            + B * S * D_MODEL + B * N_HEADS * S * S),
    )

    out2d, attn = pl.pallas_call(
        encoder_kernel,
        grid=grid,
        in_specs=in_specs,
        out_specs=out_specs,
        out_shape=out_shape,
        compiler_params=pltpu.CompilerParams(dimension_semantics=("parallel",)),
        cost_estimate=cost,
    )(q2d, k2d, v2d, mask_f, w_rq, wk, wv, wo, w1, w2, ln_pack)

    return out2d.reshape(B, S, D_MODEL), attn


def make_params(key):
    ks = jax.random.split(key, 7)
    scale = 0.02
    wfc0 = scale * jax.random.normal(ks[0], (D_MODEL, D_MODEL), jnp.float32)
    wq = scale * jax.random.normal(ks[1], (D_MODEL, D_MODEL), jnp.float32)
    wk = scale * jax.random.normal(ks[2], (D_MODEL, D_MODEL), jnp.float32)
    wv = scale * jax.random.normal(ks[3], (D_MODEL, D_MODEL), jnp.float32)
    wo = scale * jax.random.normal(ks[4], (D_MODEL, D_MODEL), jnp.float32)
    ln1_g = jnp.ones((1, D_MODEL), jnp.float32)
    ln1_b = jnp.zeros((1, D_MODEL), jnp.float32)
    w1 = scale * jax.random.normal(ks[5], (D_MODEL, D_FF), jnp.float32)
    w2 = scale * jax.random.normal(ks[6], (D_FF, D_MODEL), jnp.float32)
    ln2_g = jnp.ones((1, D_MODEL), jnp.float32)
    ln2_b = jnp.zeros((1, D_MODEL), jnp.float32)
    return (wfc0, wq, wk, wv, wo, ln1_g, ln1_b, w1, w2, ln2_g, ln2_b)


def reference(inputs_Q, inputs_K, inputs_V, attn_mask, params):
    (wfc0, wq, wk, wv, wo, ln1_g, ln1_b, w1, w2, ln2_g, ln2_b) = params
    B, S, _ = inputs_Q.shape
    residual = inputs_Q @ wfc0
    Q = (inputs_Q @ wq).reshape(B, S, N_HEADS, D_K).transpose(0, 2, 1, 3)
    K = (inputs_K @ wk).reshape(B, S, N_HEADS, D_K).transpose(0, 2, 1, 3)
    V = (inputs_V @ wv).reshape(B, S, N_HEADS, D_V).transpose(0, 2, 1, 3)
    scores = jnp.einsum("bhqd,bhkd->bhqk", Q, K) / jnp.sqrt(jnp.float32(D_K))
    scores = jnp.where(attn_mask[:, None, :, :], -1e9, scores)
    attn = jax.nn.softmax(scores, axis=-1)
    ctx = jnp.einsum("bhqk,bhkd->bhqd", attn, V).transpose(0, 2, 1, 3).reshape(
        B, S, N_HEADS * D_V)
    x1 = _layernorm(ctx @ wo + residual, ln1_g[0], ln1_b[0])
    ffn = jnp.maximum(x1 @ w1, 0.0) @ w2
    return _layernorm(ffn + x1, ln2_g[0], ln2_b[0]), attn


if __name__ == "__main__":
    key = jax.random.PRNGKey(0)
    kq, kk, kv, kp = jax.random.split(key, 4)
    B, S = 2, 8
    inputs_Q = jax.random.normal(kq, (B, S, D_MODEL), jnp.float32)
    inputs_K = jax.random.normal(kk, (B, S, D_MODEL), jnp.float32)
    inputs_V = jax.random.normal(kv, (B, S, D_MODEL), jnp.float32)
    # mask: True = masked (e.g. pad the last key position of batch 1)
    attn_mask = jnp.zeros((B, S, S), jnp.bool_)
    attn_mask = attn_mask.at[1, :, -1].set(True)

    params = make_params(kp)

    out, attn = inter_encoder_layer(inputs_Q, inputs_K, inputs_V, attn_mask, params)
    jax.block_until_ready(out)
    jax.block_until_ready(attn)

    ref_out, ref_attn = reference(inputs_Q, inputs_K, inputs_V, attn_mask, params)
    assert jnp.allclose(out, ref_out, atol=1e-4, rtol=1e-4)
    assert jnp.allclose(attn, ref_attn, atol=1e-5, rtol=1e-5)

    print("KERNEL_OK")
</pallas_src>

<mosaic_0001>
module attributes {stable_mosaic.version = 11 : i64} {
  func.func @encoder_kernel(%arg0: i32, %arg1: memref<16x128xf32, #tpu.memory_space<vmem>>, %arg2: memref<16x128xf32, #tpu.memory_space<vmem>>, %arg3: memref<16x128xf32, #tpu.memory_space<vmem>>, %arg4: memref<2x8x8xf32, #tpu.memory_space<vmem>>, %arg5: memref<128x256xf32, #tpu.memory_space<vmem>>, %arg6: memref<128x128xf32, #tpu.memory_space<vmem>>, %arg7: memref<128x128xf32, #tpu.memory_space<vmem>>, %arg8: memref<128x128xf32, #tpu.memory_space<vmem>>, %arg9: memref<128x512xf32, #tpu.memory_space<vmem>>, %arg10: memref<512x128xf32, #tpu.memory_space<vmem>>, %arg11: memref<4x128xf32, #tpu.memory_space<vmem>>, %arg12: memref<16x128xf32, #tpu.memory_space<vmem>>, %arg13: memref<2x8x8x8xf32, #tpu.memory_space<vmem>>) attributes {dimension_semantics = [#tpu.dimension_semantics<parallel>], iteration_bounds = array<i64: 1>, scalar_prefetch = 0 : i64, scratch_operands = 0 : i64, tpu.core_type = #tpu.core_type<tc>, window_params = [{transform_indices = @transform_0, window_bounds = array<i64: 16, 128>}, {transform_indices = @transform_1, window_bounds = array<i64: 16, 128>}, {transform_indices = @transform_2, window_bounds = array<i64: 16, 128>}, {transform_indices = @transform_3, window_bounds = array<i64: 2, 8, 8>}, {pipeline_mode = #tpu.pipeline_mode<synchronous>, transform_indices = @transform_4, window_bounds = array<i64: 128, 256>}, {pipeline_mode = #tpu.pipeline_mode<synchronous>, transform_indices = @transform_5, window_bounds = array<i64: 128, 128>}, {pipeline_mode = #tpu.pipeline_mode<synchronous>, transform_indices = @transform_6, window_bounds = array<i64: 128, 128>}, {pipeline_mode = #tpu.pipeline_mode<synchronous>, transform_indices = @transform_7, window_bounds = array<i64: 128, 128>}, {pipeline_mode = #tpu.pipeline_mode<synchronous>, transform_indices = @transform_8, window_bounds = array<i64: 128, 512>}, {pipeline_mode = #tpu.pipeline_mode<synchronous>, transform_indices = @transform_9, window_bounds = array<i64: 512, 128>}, {pipeline_mode = #tpu.pipeline_mode<synchronous>, transform_indices = @transform_10, window_bounds = array<i64: 4, 128>}, {transform_indices = @transform_11, window_bounds = array<i64: 16, 128>}, {transform_indices = @transform_12, window_bounds = array<i64: 2, 8, 8, 8>}]} {
    %c0 = arith.constant 0 : index
    %c0_0 = arith.constant 0 : index
    %0 = vector.load %arg1[%c0, %c0_0] : memref<16x128xf32, #tpu.memory_space<vmem>>, vector<16x128xf32>
    %c0_1 = arith.constant 0 : index
    %c0_2 = arith.constant 0 : index
    %1 = vector.load %arg2[%c0_1, %c0_2] : memref<16x128xf32, #tpu.memory_space<vmem>>, vector<16x128xf32>
    %c0_3 = arith.constant 0 : index
    %c0_4 = arith.constant 0 : index
    %2 = vector.load %arg3[%c0_3, %c0_4] : memref<16x128xf32, #tpu.memory_space<vmem>>, vector<16x128xf32>
    %c0_5 = arith.constant 0 : index
    %c0_6 = arith.constant 0 : index
    %c0_7 = arith.constant 0 : index
    %3 = vector.load %arg4[%c0_5, %c0_6, %c0_7] : memref<2x8x8xf32, #tpu.memory_space<vmem>>, vector<2x8x8xf32>
    %c0_8 = arith.constant 0 : index
    %c0_9 = arith.constant 0 : index
    %4 = vector.load %arg5[%c0_8, %c0_9] : memref<128x256xf32, #tpu.memory_space<vmem>>, vector<128x256xf32>
    %cst = arith.constant dense<0.000000e+00> : vector<16x256xf32>
    %5 = tpu.matmul %0, %4, %cst {dimension_numbers = #tpu.dot_dimension_numbers<[1], [0], [0], [1], [0, 0, 1, 1], [], []>} : vector<16x128xf32>, vector<128x256xf32>, vector<16x256xf32> -> vector<16x256xf32>
    %6 = vector.extract_strided_slice %5 {offsets = [0, 0], sizes = [16, 128], strides = [1, 1]} : vector<16x256xf32> to vector<16x128xf32>
    %7 = vector.extract_strided_slice %5 {offsets = [0, 128], sizes = [16, 128], strides = [1, 1]} : vector<16x256xf32> to vector<16x128xf32>
    %c0_10 = arith.constant 0 : index
    %c0_11 = arith.constant 0 : index
    %8 = vector.load %arg6[%c0_10, %c0_11] : memref<128x128xf32, #tpu.memory_space<vmem>>, vector<128x128xf32>
    %cst_12 = arith.constant dense<0.000000e+00> : vector<16x128xf32>
    %9 = tpu.matmul %1, %8, %cst_12 {dimension_numbers = #tpu.dot_dimension_numbers<[1], [0], [0], [1], [0, 0, 1, 1], [], []>} : vector<16x128xf32>, vector<128x128xf32>, vector<16x128xf32> -> vector<16x128xf32>
    %c0_13 = arith.constant 0 : index
    %c0_14 = arith.constant 0 : index
    %10 = vector.load %arg7[%c0_13, %c0_14] : memref<128x128xf32, #tpu.memory_space<vmem>>, vector<128x128xf32>
    %cst_15 = arith.constant dense<0.000000e+00> : vector<16x128xf32>
    %11 = tpu.matmul %2, %10, %cst_15 {dimension_numbers = #tpu.dot_dimension_numbers<[1], [0], [0], [1], [0, 0, 1, 1], [], []>} : vector<16x128xf32>, vector<128x128xf32>, vector<16x128xf32> -> vector<16x128xf32>
    %12 = vector.shape_cast %7 : vector<16x128xf32> to vector<2x8x128xf32>
    %13 = vector.extract_strided_slice %12 {offsets = [0, 0, 0], sizes = [2, 8, 16], strides = [1, 1, 1]} : vector<2x8x128xf32> to vector<2x8x16xf32>
    %14 = vector.extract_strided_slice %12 {offsets = [0, 0, 16], sizes = [2, 8, 16], strides = [1, 1, 1]} : vector<2x8x128xf32> to vector<2x8x16xf32>
    %15 = vector.extract_strided_slice %12 {offsets = [0, 0, 32], sizes = [2, 8, 16], strides = [1, 1, 1]} : vector<2x8x128xf32> to vector<2x8x16xf32>
    %16 = vector.extract_strided_slice %12 {offsets = [0, 0, 48], sizes = [2, 8, 16], strides = [1, 1, 1]} : vector<2x8x128xf32> to vector<2x8x16xf32>
    %17 = vector.extract_strided_slice %12 {offsets = [0, 0, 64], sizes = [2, 8, 16], strides = [1, 1, 1]} : vector<2x8x128xf32> to vector<2x8x16xf32>
    %18 = vector.extract_strided_slice %12 {offsets = [0, 0, 80], sizes = [2, 8, 16], strides = [1, 1, 1]} : vector<2x8x128xf32> to vector<2x8x16xf32>
    %19 = vector.extract_strided_slice %12 {offsets = [0, 0, 96], sizes = [2, 8, 16], strides = [1, 1, 1]} : vector<2x8x128xf32> to vector<2x8x16xf32>
    %20 = vector.extract_strided_slice %12 {offsets = [0, 0, 112], sizes = [2, 8, 16], strides = [1, 1, 1]} : vector<2x8x128xf32> to vector<2x8x16xf32>
    %21 = vector.shape_cast %13 : vector<2x8x16xf32> to vector<2x1x8x16xf32>
    %22 = vector.shape_cast %14 : vector<2x8x16xf32> to vector<2x1x8x16xf32>
    %23 = vector.shape_cast %15 : vector<2x8x16xf32> to vector<2x1x8x16xf32>
    %24 = vector.shape_cast %16 : vector<2x8x16xf32> to vector<2x1x8x16xf32>
    %25 = vector.shape_cast %17 : vector<2x8x16xf32> to vector<2x1x8x16xf32>
    %26 = vector.shape_cast %18 : vector<2x8x16xf32> to vector<2x1x8x16xf32>
    %27 = vector.shape_cast %19 : vector<2x8x16xf32> to vector<2x1x8x16xf32>
    %28 = vector.shape_cast %20 : vector<2x8x16xf32> to vector<2x1x8x16xf32>
    %29 = tpu.concatenate %21, %22, %23, %24, %25, %26, %27, %28 in 1 : vector<2x1x8x16xf32>, vector<2x1x8x16xf32>, vector<2x1x8x16xf32>, vector<2x1x8x16xf32>, vector<2x1x8x16xf32>, vector<2x1x8x16xf32>, vector<2x1x8x16xf32>, vector<2x1x8x16xf32> -> vector<2x8x8x16xf32>
    %30 = vector.shape_cast %29 : vector<2x8x8x16xf32> to vector<16x8x16xf32>
    %31 = vector.shape_cast %9 : vector<16x128xf32> to vector<2x8x128xf32>
    %32 = vector.extract_strided_slice %31 {offsets = [0, 0, 0], sizes = [2, 8, 16], strides = [1, 1, 1]} : vector<2x8x128xf32> to vector<2x8x16xf32>
    %33 = vector.extract_strided_slice %31 {offsets = [0, 0, 16], sizes = [2, 8, 16], strides = [1, 1, 1]} : vector<2x8x128xf32> to vector<2x8x16xf32>
    %34 = vector.extract_strided_slice %31 {offsets = [0, 0, 32], sizes = [2, 8, 16], strides = [1, 1, 1]} : vector<2x8x128xf32> to vector<2x8x16xf32>
    %35 = vector.extract_strided_slice %31 {offsets = [0, 0, 48], sizes = [2, 8, 16], strides = [1, 1, 1]} : vector<2x8x128xf32> to vector<2x8x16xf32>
    %36 = vector.extract_strided_slice %31 {offsets = [0, 0, 64], sizes = [2, 8, 16], strides = [1, 1, 1]} : vector<2x8x128xf32> to vector<2x8x16xf32>
    %37 = vector.extract_strided_slice %31 {offsets = [0, 0, 80], sizes = [2, 8, 16], strides = [1, 1, 1]} : vector<2x8x128xf32> to vector<2x8x16xf32>
    %38 = vector.extract_strided_slice %31 {offsets = [0, 0, 96], sizes = [2, 8, 16], strides = [1, 1, 1]} : vector<2x8x128xf32> to vector<2x8x16xf32>
    %39 = vector.extract_strided_slice %31 {offsets = [0, 0, 112], sizes = [2, 8, 16], strides = [1, 1, 1]} : vector<2x8x128xf32> to vector<2x8x16xf32>
    %40 = vector.shape_cast %32 : vector<2x8x16xf32> to vector<2x1x8x16xf32>
    %41 = vector.shape_cast %33 : vector<2x8x16xf32> to vector<2x1x8x16xf32>
    %42 = vector.shape_cast %34 : vector<2x8x16xf32> to vector<2x1x8x16xf32>
    %43 = vector.shape_cast %35 : vector<2x8x16xf32> to vector<2x1x8x16xf32>
    %44 = vector.shape_cast %36 : vector<2x8x16xf32> to vector<2x1x8x16xf32>
    %45 = vector.shape_cast %37 : vector<2x8x16xf32> to vector<2x1x8x16xf32>
    %46 = vector.shape_cast %38 : vector<2x8x16xf32> to vector<2x1x8x16xf32>
    %47 = vector.shape_cast %39 : vector<2x8x16xf32> to vector<2x1x8x16xf32>
    %48 = tpu.concatenate %40, %41, %42, %43, %44, %45, %46, %47 in 1 : vector<2x1x8x16xf32>, vector<2x1x8x16xf32>, vector<2x1x8x16xf32>, vector<2x1x8x16xf32>, vector<2x1x8x16xf32>, vector<2x1x8x16xf32>, vector<2x1x8x16xf32>, vector<2x1x8x16xf32> -> vector<2x8x8x16xf32>
    %49 = vector.shape_cast %48 : vector<2x8x8x16xf32> to vector<16x8x16xf32>
    %50 = vector.shape_cast %11 : vector<16x128xf32> to vector<2x8x128xf32>
    %51 = vector.extract_strided_slice %50 {offsets = [0, 0, 0], sizes = [2, 8, 16], strides = [1, 1, 1]} : vector<2x8x128xf32> to vector<2x8x16xf32>
    %52 = vector.extract_strided_slice %50 {offsets = [0, 0, 16], sizes = [2, 8, 16], strides = [1, 1, 1]} : vector<2x8x128xf32> to vector<2x8x16xf32>
    %53 = vector.extract_strided_slice %50 {offsets = [0, 0, 32], sizes = [2, 8, 16], strides = [1, 1, 1]} : vector<2x8x128xf32> to vector<2x8x16xf32>
    %54 = vector.extract_strided_slice %50 {offsets = [0, 0, 48], sizes = [2, 8, 16], strides = [1, 1, 1]} : vector<2x8x128xf32> to vector<2x8x16xf32>
    %55 = vector.extract_strided_slice %50 {offsets = [0, 0, 64], sizes = [2, 8, 16], strides = [1, 1, 1]} : vector<2x8x128xf32> to vector<2x8x16xf32>
    %56 = vector.extract_strided_slice %50 {offsets = [0, 0, 80], sizes = [2, 8, 16], strides = [1, 1, 1]} : vector<2x8x128xf32> to vector<2x8x16xf32>
    %57 = vector.extract_strided_slice %50 {offsets = [0, 0, 96], sizes = [2, 8, 16], strides = [1, 1, 1]} : vector<2x8x128xf32> to vector<2x8x16xf32>
    %58 = vector.extract_strided_slice %50 {offsets = [0, 0, 112], sizes = [2, 8, 16], strides = [1, 1, 1]} : vector<2x8x128xf32> to vector<2x8x16xf32>
    %59 = vector.shape_cast %51 : vector<2x8x16xf32> to vector<2x1x8x16xf32>
    %60 = vector.shape_cast %52 : vector<2x8x16xf32> to vector<2x1x8x16xf32>
    %61 = vector.shape_cast %53 : vector<2x8x16xf32> to vector<2x1x8x16xf32>
    %62 = vector.shape_cast %54 : vector<2x8x16xf32> to vector<2x1x8x16xf32>
    %63 = vector.shape_cast %55 : vector<2x8x16xf32> to vector<2x1x8x16xf32>
    %64 = vector.shape_cast %56 : vector<2x8x16xf32> to vector<2x1x8x16xf32>
    %65 = vector.shape_cast %57 : vector<2x8x16xf32> to vector<2x1x8x16xf32>
    %66 = vector.shape_cast %58 : vector<2x8x16xf32> to vector<2x1x8x16xf32>
    %67 = tpu.concatenate %59, %60, %61, %62, %63, %64, %65, %66 in 1 : vector<2x1x8x16xf32>, vector<2x1x8x16xf32>, vector<2x1x8x16xf32>, vector<2x1x8x16xf32>, vector<2x1x8x16xf32>, vector<2x1x8x16xf32>, vector<2x1x8x16xf32>, vector<2x1x8x16xf32> -> vector<2x8x8x16xf32>
    %68 = vector.shape_cast %67 : vector<2x8x8x16xf32> to vector<16x8x16xf32>
    %cst_16 = arith.constant 1.600000e+01 : f32
    %69 = math.sqrt %cst_16 : f32
    %cst_17 = arith.constant 1.000000e+00 : f32
    %70 = arith.divf %cst_17, %69 : f32
    "tpu.trace_start"() <{level = 10 : i32, message = "bqd,bkd->bqk"}> : () -> ()
    %cst_18 = arith.constant dense<0.000000e+00> : vector<16x8x8xf32>
    %71 = tpu.matmul %30, %49, %cst_18 {dimension_numbers = #tpu.dot_dimension_numbers<[2], [2], [1], [1], [0, 0, 0, 1, 1, 1], [0], [0]>} : vector<16x8x16xf32>, vector<16x8x16xf32>, vector<16x8x8xf32> -> vector<16x8x8xf32>
    "tpu.trace_stop"() : () -> ()
    %72 = vector.broadcast %70 : f32 to vector<16x8x8xf32>
    %73 = arith.mulf %71, %72 : vector<16x8x8xf32>
    %74 = vector.shape_cast %3 : vector<2x8x8xf32> to vector<2x1x8x8xf32>
    %75 = vector.shape_cast %74 : vector<2x1x8x8xf32> to vector<2x1x8x8xf32>
    %76 = vector.broadcast %75 : vector<2x1x8x8xf32> to vector<2x8x8x8xf32>
    %77 = vector.shape_cast %76 : vector<2x8x8x8xf32> to vector<16x8x8xf32>
    %cst_19 = arith.constant 5.000000e-01 : f32
    %78 = vector.broadcast %cst_19 : f32 to vector<16x8x8xf32>
    %79 = arith.cmpf ogt, %77, %78 : vector<16x8x8xf32>
    %cst_20 = arith.constant -1.000000e+09 : f32
    %80 = vector.broadcast %cst_20 : f32 to vector<16x8x8xf32>
    %81 = arith.select %79, %80, %73 : vector<16x8x8xi1>, vector<16x8x8xf32>
    %cst_21 = arith.constant dense<0xFF800000> : vector<16x8xf32>
    %82 = vector.multi_reduction <maximumf>, %81, %cst_21 [2] : vector<16x8x8xf32> to vector<16x8xf32>
    %83 = vector.shape_cast %82 : vector<16x8xf32> to vector<16x8x1xf32>
    %84 = vector.broadcast %83 : vector<16x8x1xf32> to vector<16x8x8xf32>
    %85 = arith.subf %81, %84 : vector<16x8x8xf32>
    %86 = math.exp %85 : vector<16x8x8xf32>
    %cst_22 = arith.constant dense<0.000000e+00> : vector<16x8xf32>
    %87 = vector.multi_reduction <add>, %86, %cst_22 [2] : vector<16x8x8xf32> to vector<16x8xf32>
    %88 = vector.shape_cast %87 : vector<16x8xf32> to vector<16x8x1xf32>
    %89 = vector.broadcast %88 : vector<16x8x1xf32> to vector<16x8x8xf32>
    %90 = arith.divf %86, %89 : vector<16x8x8xf32>
    %91 = vector.shape_cast %90 : vector<16x8x8xf32> to vector<2x8x8x8xf32>
    %c0_23 = arith.constant 0 : index
    %c0_24 = arith.constant 0 : index
    %c0_25 = arith.constant 0 : index
    %c0_26 = arith.constant 0 : index
    %92 = vector.load %arg13[%c0_23, %c0_24, %c0_25, %c0_26] : memref<2x8x8x8xf32, #tpu.memory_space<vmem>>, vector<2x8x8x8xf32>
    tpu.vector_store %arg13[%c0_23, %c0_24, %c0_25, %c0_26], %91 {strides = array<i32>} : memref<2x8x8x8xf32, #tpu.memory_space<vmem>>, vector<2x8x8x8xf32>,
    "tpu.trace_start"() <{level = 10 : i32, message = "bqk,bkd->bqd"}> : () -> ()
    %cst_27 = arith.constant dense<0.000000e+00> : vector<16x8x16xf32>
    %93 = tpu.matmul %90, %68, %cst_27 {dimension_numbers = #tpu.dot_dimension_numbers<[2], [1], [1], [2], [0, 0, 0, 1, 1, 2], [0], [0]>} : vector<16x8x8xf32>, vector<16x8x16xf32>, vector<16x8x16xf32> -> vector<16x8x16xf32>
    "tpu.trace_stop"() : () -> ()
    %94 = vector.shape_cast %93 : vector<16x8x16xf32> to vector<2x8x8x16xf32>
    %95 = vector.extract_strided_slice %94 {offsets = [0, 0, 0, 0], sizes = [2, 1, 8, 16], strides = [1, 1, 1, 1]} : vector<2x8x8x16xf32> to vector<2x1x8x16xf32>
    %96 = vector.shape_cast %95 : vector<2x1x8x16xf32> to vector<2x8x16xf32>
    %97 = vector.extract_strided_slice %94 {offsets = [0, 1, 0, 0], sizes = [2, 1, 8, 16], strides = [1, 1, 1, 1]} : vector<2x8x8x16xf32> to vector<2x1x8x16xf32>
    %98 = vector.shape_cast %97 : vector<2x1x8x16xf32> to vector<2x8x16xf32>
    %99 = vector.extract_strided_slice %94 {offsets = [0, 2, 0, 0], sizes = [2, 1, 8, 16], strides = [1, 1, 1, 1]} : vector<2x8x8x16xf32> to vector<2x1x8x16xf32>
    %100 = vector.shape_cast %99 : vector<2x1x8x16xf32> to vector<2x8x16xf32>
    %101 = vector.extract_strided_slice %94 {offsets = [0, 3, 0, 0], sizes = [2, 1, 8, 16], strides = [1, 1, 1, 1]} : vector<2x8x8x16xf32> to vector<2x1x8x16xf32>
    %102 = vector.shape_cast %101 : vector<2x1x8x16xf32> to vector<2x8x16xf32>
    %103 = vector.extract_strided_slice %94 {offsets = [0, 4, 0, 0], sizes = [2, 1, 8, 16], strides = [1, 1, 1, 1]} : vector<2x8x8x16xf32> to vector<2x1x8x16xf32>
    %104 = vector.shape_cast %103 : vector<2x1x8x16xf32> to vector<2x8x16xf32>
    %105 = vector.extract_strided_slice %94 {offsets = [0, 5, 0, 0], sizes = [2, 1, 8, 16], strides = [1, 1, 1, 1]} : vector<2x8x8x16xf32> to vector<2x1x8x16xf32>
    %106 = vector.shape_cast %105 : vector<2x1x8x16xf32> to vector<2x8x16xf32>
    %107 = vector.extract_strided_slice %94 {offsets = [0, 6, 0, 0], sizes = [2, 1, 8, 16], strides = [1, 1, 1, 1]} : vector<2x8x8x16xf32> to vector<2x1x8x16xf32>
    %108 = vector.shape_cast %107 : vector<2x1x8x16xf32> to vector<2x8x16xf32>
    %109 = vector.extract_strided_slice %94 {offsets = [0, 7, 0, 0], sizes = [2, 1, 8, 16], strides = [1, 1, 1, 1]} : vector<2x8x8x16xf32> to vector<2x1x8x16xf32>
    %110 = vector.shape_cast %109 : vector<2x1x8x16xf32> to vector<2x8x16xf32>
    %111 = tpu.concatenate %96, %98, %100, %102, %104, %106, %108, %110 in 2 : vector<2x8x16xf32>, vector<2x8x16xf32>, vector<2x8x16xf32>, vector<2x8x16xf32>, vector<2x8x16xf32>, vector<2x8x16xf32>, vector<2x8x16xf32>, vector<2x8x16xf32> -> vector<2x8x128xf32>
    %112 = vector.shape_cast %111 : vector<2x8x128xf32> to vector<16x128xf32>
    %c0_28 = arith.constant 0 : index
    %c0_29 = arith.constant 0 : index
    %113 = vector.load %arg11[%c0_28, %c0_29] : memref<4x128xf32, #tpu.memory_space<vmem>>, vector<4x128xf32>
    %c0_30 = arith.constant 0 : index
    %c0_31 = arith.constant 0 : index
    %114 = vector.load %arg8[%c0_30, %c0_31] : memref<128x128xf32, #tpu.memory_space<vmem>>, vector<128x128xf32>
    %cst_32 = arith.constant dense<0.000000e+00> : vector<16x128xf32>
    %115 = tpu.matmul %112, %114, %cst_32 {dimension_numbers = #tpu.dot_dimension_numbers<[1], [0], [0], [1], [0, 0, 1, 1], [], []>} : vector<16x128xf32>, vector<128x128xf32>, vector<16x128xf32> -> vector<16x128xf32>
    %116 = arith.addf %115, %6 : vector<16x128xf32>
    %117 = vector.extract_strided_slice %113 {offsets = [0, 0], sizes = [1, 128], strides = [1, 1]} : vector<4x128xf32> to vector<1x128xf32>
    %118 = vector.shape_cast %117 : vector<1x128xf32> to vector<128xf32>
    %119 = vector.extract_strided_slice %113 {offsets = [1, 0], sizes = [1, 128], strides = [1, 1]} : vector<4x128xf32> to vector<1x128xf32>
    %120 = vector.shape_cast %119 : vector<1x128xf32> to vector<128xf32>
    %cst_33 = arith.constant dense<0.000000e+00> : vector<16xf32>
    %121 = vector.multi_reduction <add>, %116, %cst_33 [1] : vector<16x128xf32> to vector<16xf32>
    %122 = vector.shape_cast %121 : vector<16xf32> to vector<16x1xf32>
    %cst_34 = arith.constant 1.280000e+02 : f32
    %123 = vector.broadcast %cst_34 : f32 to vector<16x1xf32>
    %124 = arith.divf %122, %123 : vector<16x1xf32>
    %125 = vector.broadcast %124 : vector<16x1xf32> to vector<16x128xf32>
    %126 = arith.subf %116, %125 : vector<16x128xf32>
    %127 = arith.mulf %126, %126 : vector<16x128xf32>
    %cst_35 = arith.constant dense<0.000000e+00> : vector<16xf32>
    %128 = vector.multi_reduction <add>, %127, %cst_35 [1] : vector<16x128xf32> to vector<16xf32>
    %129 = vector.shape_cast %128 : vector<16xf32> to vector<16x1xf32>
    %cst_36 = arith.constant 1.280000e+02 : f32
    %130 = vector.broadcast %cst_36 : f32 to vector<16x1xf32>
    %131 = arith.divf %129, %130 : vector<16x1xf32>
    %132 = vector.broadcast %124 : vector<16x1xf32> to vector<16x128xf32>
    %133 = arith.subf %116, %132 : vector<16x128xf32>
    %cst_37 = arith.constant 9.99999974E-6 : f32
    %134 = vector.broadcast %cst_37 : f32 to vector<16x1xf32>
    %135 = arith.addf %131, %134 : vector<16x1xf32>
    %136 = math.rsqrt %135 : vector<16x1xf32>
    %137 = vector.broadcast %136 : vector<16x1xf32> to vector<16x128xf32>
    %138 = arith.mulf %133, %137 : vector<16x128xf32>
    %139 = vector.shape_cast %118 : vector<128xf32> to vector<1x128xf32>
    %140 = vector.broadcast %139 : vector<1x128xf32> to vector<16x128xf32>
    %141 = arith.mulf %138, %140 : vector<16x128xf32>
    %142 = vector.shape_cast %120 : vector<128xf32> to vector<1x128xf32>
    %143 = vector.broadcast %142 : vector<1x128xf32> to vector<16x128xf32>
    %144 = arith.addf %141, %143 : vector<16x128xf32>
    %c0_38 = arith.constant 0 : index
    %c0_39 = arith.constant 0 : index
    %145 = vector.load %arg9[%c0_38, %c0_39] : memref<128x512xf32, #tpu.memory_space<vmem>>, vector<128x512xf32>
    %cst_40 = arith.constant dense<0.000000e+00> : vector<16x512xf32>
    %146 = tpu.matmul %144, %145, %cst_40 {dimension_numbers = #tpu.dot_dimension_numbers<[1], [0], [0], [1], [0, 0, 1, 1], [], []>} : vector<16x128xf32>, vector<128x512xf32>, vector<16x512xf32> -> vector<16x512xf32>
    %cst_41 = arith.constant 0.000000e+00 : f32
    %147 = vector.broadcast %cst_41 : f32 to vector<16x512xf32>
    %148 = arith.maximumf %146, %147 : vector<16x512xf32>
    %c0_42 = arith.constant 0 : index
    %c0_43 = arith.constant 0 : index
    %149 = vector.load %arg10[%c0_42, %c0_43] : memref<512x128xf32, #tpu.memory_space<vmem>>, vector<512x128xf32>
    %cst_44 = arith.constant dense<0.000000e+00> : vector<16x128xf32>
    %150 = tpu.matmul %148, %149, %cst_44 {dimension_numbers = #tpu.dot_dimension_numbers<[1], [0], [0], [1], [0, 0, 1, 1], [], []>} : vector<16x512xf32>, vector<512x128xf32>, vector<16x128xf32> -> vector<16x128xf32>
    %151 = arith.addf %150, %144 : vector<16x128xf32>
    %152 = vector.extract_strided_slice %113 {offsets = [2, 0], sizes = [1, 128], strides = [1, 1]} : vector<4x128xf32> to vector<1x128xf32>
    %153 = vector.shape_cast %152 : vector<1x128xf32> to vector<128xf32>
    %154 = vector.extract_strided_slice %113 {offsets = [3, 0], sizes = [1, 128], strides = [1, 1]} : vector<4x128xf32> to vector<1x128xf32>
    %155 = vector.shape_cast %154 : vector<1x128xf32> to vector<128xf32>
    %cst_45 = arith.constant dense<0.000000e+00> : vector<16xf32>
    %156 = vector.multi_reduction <add>, %151, %cst_45 [1] : vector<16x128xf32> to vector<16xf32>
    %157 = vector.shape_cast %156 : vector<16xf32> to vector<16x1xf32>
    %cst_46 = arith.constant 1.280000e+02 : f32
    %158 = vector.broadcast %cst_46 : f32 to vector<16x1xf32>
    %159 = arith.divf %157, %158 : vector<16x1xf32>
    %160 = vector.broadcast %159 : vector<16x1xf32> to vector<16x128xf32>
    %161 = arith.subf %151, %160 : vector<16x128xf32>
    %162 = arith.mulf %161, %161 : vector<16x128xf32>
    %cst_47 = arith.constant dense<0.000000e+00> : vector<16xf32>
    %163 = vector.multi_reduction <add>, %162, %cst_47 [1] : vector<16x128xf32> to vector<16xf32>
    %164 = vector.shape_cast %163 : vector<16xf32> to vector<16x1xf32>
    %cst_48 = arith.constant 1.280000e+02 : f32
    %165 = vector.broadcast %cst_48 : f32 to vector<16x1xf32>
    %166 = arith.divf %164, %165 : vector<16x1xf32>
    %167 = vector.broadcast %159 : vector<16x1xf32> to vector<16x128xf32>
    %168 = arith.subf %151, %167 : vector<16x128xf32>
    %cst_49 = arith.constant 9.99999974E-6 : f32
    %169 = vector.broadcast %cst_49 : f32 to vector<16x1xf32>
    %170 = arith.addf %166, %169 : vector<16x1xf32>
    %171 = math.rsqrt %170 : vector<16x1xf32>
    %172 = vector.broadcast %171 : vector<16x1xf32> to vector<16x128xf32>
    %173 = arith.mulf %168, %172 : vector<16x128xf32>
    %174 = vector.shape_cast %153 : vector<128xf32> to vector<1x128xf32>
    %175 = vector.broadcast %174 : vector<1x128xf32> to vector<16x128xf32>
    %176 = arith.mulf %173, %175 : vector<16x128xf32>
    %177 = vector.shape_cast %155 : vector<128xf32> to vector<1x128xf32>
    %178 = vector.broadcast %177 : vector<1x128xf32> to vector<16x128xf32>
    %179 = arith.addf %176, %178 : vector<16x128xf32>
    %c0_50 = arith.constant 0 : index
    %c0_51 = arith.constant 0 : index
    %180 = vector.load %arg12[%c0_50, %c0_51] : memref<16x128xf32, #tpu.memory_space<vmem>>, vector<16x128xf32>
    tpu.vector_store %arg12[%c0_50, %c0_51], %179 {strides = array<i32>} : memref<16x128xf32, #tpu.memory_space<vmem>>, vector<16x128xf32>,
    return
  }
  func.func @transform_0(%arg0: i32) -> (i32, i32) {
    %c0_i32 = arith.constant 0 : i32
    %c0_i32_0 = arith.constant 0 : i32
    return %arg0, %c0_i32 : i32, i32
  }
  func.func @transform_1(%arg0: i32) -> (i32, i32) {
    %c0_i32 = arith.constant 0 : i32
    %c0_i32_0 = arith.constant 0 : i32
    return %arg0, %c0_i32 : i32, i32
  }
  func.func @transform_2(%arg0: i32) -> (i32, i32) {
    %c0_i32 = arith.constant 0 : i32
    %c0_i32_0 = arith.constant 0 : i32
    return %arg0, %c0_i32 : i32, i32
  }
  func.func @transform_3(%arg0: i32) -> (i32, i32, i32) {
    %c0_i32 = arith.constant 0 : i32
    %c0_i32_0 = arith.constant 0 : i32
    %c0_i32_1 = arith.constant 0 : i32
    return %arg0, %c0_i32, %c0_i32_0 : i32, i32, i32
  }
  func.func @transform_4(%arg0: i32) -> (i32, i32) {
    %c0_i32 = arith.constant 0 : i32
    %c0_i32_0 = arith.constant 0 : i32
    %c0_i32_1 = arith.constant 0 : i32
    return %c0_i32, %c0_i32_0 : i32, i32
  }
  func.func @transform_5(%arg0: i32) -> (i32, i32) {
    %c0_i32 = arith.constant 0 : i32
    %c0_i32_0 = arith.constant 0 : i32
    %c0_i32_1 = arith.constant 0 : i32
    return %c0_i32, %c0_i32_0 : i32, i32
  }
  func.func @transform_6(%arg0: i32) -> (i32, i32) {
    %c0_i32 = arith.constant 0 : i32
    %c0_i32_0 = arith.constant 0 : i32
    %c0_i32_1 = arith.constant 0 : i32
    return %c0_i32, %c0_i32_0 : i32, i32
  }
  func.func @transform_7(%arg0: i32) -> (i32, i32) {
    %c0_i32 = arith.constant 0 : i32
    %c0_i32_0 = arith.constant 0 : i32
    %c0_i32_1 = arith.constant 0 : i32
    return %c0_i32, %c0_i32_0 : i32, i32
  }
  func.func @transform_8(%arg0: i32) -> (i32, i32) {
    %c0_i32 = arith.constant 0 : i32
    %c0_i32_0 = arith.constant 0 : i32
    %c0_i32_1 = arith.constant 0 : i32
    return %c0_i32, %c0_i32_0 : i32, i32
  }
  func.func @transform_9(%arg0: i32) -> (i32, i32) {
    %c0_i32 = arith.constant 0 : i32
    %c0_i32_0 = arith.constant 0 : i32
    %c0_i32_1 = arith.constant 0 : i32
    return %c0_i32, %c0_i32_0 : i32, i32
  }
  func.func @transform_10(%arg0: i32) -> (i32, i32) {
    %c0_i32 = arith.constant 0 : i32
    %c0_i32_0 = arith.constant 0 : i32
    %c0_i32_1 = arith.constant 0 : i32
    return %c0_i32, %c0_i32_0 : i32, i32
  }
  func.func @transform_11(%arg0: i32) -> (i32, i32) {
    %c0_i32 = arith.constant 0 : i32
    %c0_i32_0 = arith.constant 0 : i32
    return %arg0, %c0_i32 : i32, i32
  }
  func.func @transform_12(%arg0: i32) -> (i32, i32, i32, i32) {
    %c0_i32 = arith.constant 0 : i32
    %c0_i32_0 = arith.constant 0 : i32
    %c0_i32_1 = arith.constant 0 : i32
    %c0_i32_2 = arith.constant 0 : i32
    return %arg0, %c0_i32, %c0_i32_0, %c0_i32_1 : i32, i32, i32, i32
  }
}

</mosaic_0001>

<bundles_post_ra>
// kernel: tpu_custom_call.1
= control target key start
LH: loop header
LB: loop body
LE: loop exit
PB: predicated region body
PF: predicated region fallthrough
CT: control target
= control target key end

     0   :  { %18 = vsyncpa [#allocation3], 0  ;;  %s5845_s0 = inlined_call_operand.hbm [shape: f32[16,128], index: 0, kind: input, shape index: {}]   ;;  %s5846_s1 = inlined_call_operand.hbm [shape: f32[16,128], index: 1, kind: input, shape index: {}]   ;;  %s5847_s2 = inlined_call_operand.hbm [shape: f32[16,128], index: 2, kind: input, shape index: {}]   ;;  %s5848_s3 = inlined_call_operand.hbm [shape: f32[2,8,8], index: 3, kind: input, shape index: {}]   ;;  %s5849_s4 = inlined_call_operand.hbm [shape: f32[128,256], index: 4, kind: input, shape index: {}]   ;;  %s5850_s5 = inlined_call_operand.hbm [shape: f32[128,128], index: 5, kind: input, shape index: {}]   ;;  %s5851_s6 = inlined_call_operand.hbm [shape: f32[128,128], index: 6, kind: input, shape index: {}]   ;;  %s5852_s7 = inlined_call_operand.hbm [shape: f32[128,128], index: 7, kind: input, shape index: {}]   ;;  %s5853_s8 = inlined_call_operand.hbm [shape: f32[128,512], index: 8, kind: input, shape index: {}]   ;;  %s5854_s9 = inlined_call_operand.hbm [shape: f32[512,128], index: 9, kind: input, shape index: {}]   ;;  %s5855_s10 = inlined_call_operand.vmem [shape: f32[4,128], index: 10, kind: input, shape index: {}]   ;;  %s5856_s11 = inlined_call_operand.hbm [shape: f32[16,128], index: 11, kind: output, shape index: {0}]   ;;  %s5857_s12 = inlined_call_operand.hbm [shape: f32[2,8,8,8], index: 12, kind: output, shape index: {1}]  }
   0x1   :  { %19 = vsyncpa [#allocation6], 0 }
   0x2   :  { %20 = vsyncpa [#allocation9], 0 }
   0x3   :  { %21 = vsyncpa [#allocation12], 0 }
   0x4   :  { %22 = vsyncpa [#allocation15], 0 }
   0x5   :  { %23 = vsyncpa [#allocation18], 0 }
   0x6   :  { %24 = vsyncpa [#allocation4], 0 }
   0x7   :  { %25 = vsyncpa [#allocation21], 0  ;;  %s5053_s21 = smov [#allocation5]   ;;  %s5054_s23 = smov [#allocation8]  }
   0x8   :  { %s43_s22 = sshll.u32 %s5053_s21, 4  ;;  %s67_s24 = sshll.u32 %s5054_s23, 4  ;;  %s44_s22 = int_to_ptr.vmem [resolvable:$true] %s43_s22  ;;  %s5143_s24 = int_to_ptr.vmem [resolvable:$true] %s67_s24 }
   0x9   :  { %s4773_s27 = scalar_lea.hbm %s5846_s1, 256 }
   0xa   :  { %p4774_p0 = scmp.ne.s32.totalorder %s5846_s1, %s4773_s27  ;;  %p4777_p1 = scmp.lt.u32.totalorder %s4773_s27, %s5846_s1 }
   0xc   :  { %p4779_p2 = pnand %p4777_p1, %p4774_p0 }
   0xe   :  { %4782 = shalt.err (!%p4779_p2)
}
   0xf   :  { %s4783_s14 = scalar_lea.vmem %s44_s22, 256  ;;  %p4788_p4 = scmp.lt.s32.totalorder %s44_s22, %s44_s22 }
  0x10   :  { %p4784_p3 = scmp.ne.s32.totalorder %s44_s22, %s4783_s14  ;;  %p4789_p5 = scmp.lt.s32.totalorder %s4783_s14, %s4783_s14 }
  0x12   :  { %p4790_p6 = por %p4789_p5, %p4788_p4 }
  0x14   :  { %p4791_p7 = pnand %p4790_p6, %p4784_p3 }
  0x16   :  { %4794 = shalt.err (!%p4791_p7)
}
  0x17   :  { %s5055_s15 = smov 128   ;;  %s5056_s16 = smov 8  }
  0x18   :  { %49 = dma.hbm_to_vmem [thread:$0]  %s5846_s1, 256, %s44_s22, [#allocation6], %s5055_s15, %s5055_s15, %s5056_s16  }
  0x19   :  { %s4795_s21 = scalar_lea.hbm %s5848_s3, 256 }
  0x1a   :  { %p4796_p8 = scmp.ne.s32.totalorder %s5848_s3, %s4795_s21  ;;  %p4799_p9 = scmp.lt.u32.totalorder %s4795_s21, %s5848_s3 }
  0x1c   :  { %p4801_p10 = pnand %p4799_p9, %p4796_p8 }
  0x1e   :  { %4804 = shalt.err (!%p4801_p10)
}
  0x1f   :  { %s4805_s28 = scalar_lea.vmem %s5143_s24, 256  ;;  %p4810_p12 = scmp.lt.s32.totalorder %s5143_s24, %s5143_s24 }
  0x20   :  { %p4806_p11 = scmp.ne.s32.totalorder %s5143_s24, %s4805_s28  ;;  %p4811_p13 = scmp.lt.s32.totalorder %s4805_s28, %s4805_s28 }
  0x22   :  { %p4812_p0 = por %p4811_p13, %p4810_p12 }
  0x24   :  { %p4813_p1 = pnand %p4812_p0, %p4806_p11 }
  0x26   :  { %4816 = shalt.err (!%p4813_p1)
}
  0x27   :  { %73 = dma.hbm_to_vmem [thread:$0]  %s5848_s3, 256, %s5143_s24, [#allocation9], %s5055_s15, %s5055_s15, %s5056_s16  }
  0x28   :  { %s5057_s29 = smov [#allocation11]   ;;  %s5058_s13 = smov [#allocation14]  }
  0x29   :  { %s91_s30 = sshll.u32 %s5057_s29, 4  ;;  %s115_s14 = sshll.u32 %s5058_s13, 4  ;;  %s92_s30 = int_to_ptr.vmem [resolvable:$true] %s91_s30  ;;  %s5180_s14 = int_to_ptr.vmem [resolvable:$true] %s115_s14 }
  0x2a   :  { %s4817_s19 = scalar_lea.hbm %s5850_s5, 2048 }
  0x2b   :  { %p4818_p2 = scmp.ne.s32.totalorder %s5850_s5, %s4817_s19  ;;  %p4821_p3 = scmp.lt.u32.totalorder %s4817_s19, %s5850_s5 }
  0x2d   :  { %p4823_p4 = pnand %p4821_p3, %p4818_p2 }
  0x2f   :  { %4826 = shalt.err (!%p4823_p4)
}
  0x30   :  { %s4827_s3 = scalar_lea.vmem %s92_s30, 2048  ;;  %p4832_p6 = scmp.lt.s32.totalorder %s92_s30, %s92_s30 }
  0x31   :  { %p4828_p5 = scmp.ne.s32.totalorder %s92_s30, %s4827_s3  ;;  %p4833_p7 = scmp.lt.s32.totalorder %s4827_s3, %s4827_s3 }
  0x33   :  { %p4834_p8 = por %p4833_p7, %p4832_p6 }
  0x35   :  { %p4835_p9 = pnand %p4834_p8, %p4828_p5 }
  0x37   :  { %4838 = shalt.err (!%p4835_p9)
}
  0x38   :  { %97 = dma.hbm_to_vmem [thread:$0]  %s5850_s5, 2048, %s92_s30, [#allocation12], %s5055_s15, %s5055_s15, %s5056_s16  }
  0x39   :  { %s4839_s1 = scalar_lea.hbm %s5852_s7, 2048 }
  0x3a   :  { %p4840_p10 = scmp.ne.s32.totalorder %s5852_s7, %s4839_s1  ;;  %p4843_p11 = scmp.lt.u32.totalorder %s4839_s1, %s5852_s7 }
  0x3c   :  { %p4845_p12 = pnand %p4843_p11, %p4840_p10 }
  0x3e   :  { %4848 = shalt.err (!%p4845_p12)
}
  0x3f   :  { %s4849_s18 = scalar_lea.vmem %s5180_s14, 2048  ;;  %p4854_p0 = scmp.lt.s32.totalorder %s5180_s14, %s5180_s14 }
  0x40   :  { %p4850_p13 = scmp.ne.s32.totalorder %s5180_s14, %s4849_s18  ;;  %p4855_p1 = scmp.lt.s32.totalorder %s4849_s18, %s4849_s18 }
  0x42   :  { %p4856_p2 = por %p4855_p1, %p4854_p0 }
  0x44   :  { %p4857_p3 = pnand %p4856_p2, %p4850_p13 }
  0x46   :  { %4860 = shalt.err (!%p4857_p3)
}
  0x47   :  { %121 = dma.hbm_to_vmem [thread:$0]  %s5852_s7, 2048, %s5180_s14, [#allocation15], %s5055_s15, %s5055_s15, %s5056_s16  }
  0x48   :  { %s5059_s19 = smov [#allocation2]   ;;  %s5060_s21 = smov [#allocation7]  }
  0x49   :  { %s31_s20 = sshll.u32 %s5059_s19, 4  ;;  %s55_s23 = sshll.u32 %s5060_s21, 4  ;;  %s32_s20 = int_to_ptr.vmem [resolvable:$true] %s31_s20  ;;  %s5217_s23 = int_to_ptr.vmem [resolvable:$true] %s55_s23 }
  0x4a   :  { %s4861_s24 = scalar_lea.hbm %s5845_s0, 256 }
  0x4b   :  { %p4862_p4 = scmp.ne.s32.totalorder %s5845_s0, %s4861_s24  ;;  %p4865_p5 = scmp.lt.u32.totalorder %s4861_s24, %s5845_s0 }
  0x4d   :  { %p4867_p6 = pnand %p4865_p5, %p4862_p4 }
  0x4f   :  { %4870 = shalt.err (!%p4867_p6)
}
  0x50   :  { %s4871_s7 = scalar_lea.vmem %s32_s20, 256  ;;  %p4876_p8 = scmp.lt.s32.totalorder %s32_s20, %s32_s20 }
  0x51   :  { %p4872_p7 = scmp.ne.s32.totalorder %s32_s20, %s4871_s7  ;;  %p4877_p9 = scmp.lt.s32.totalorder %s4871_s7, %s4871_s7 }
  0x53   :  { %p4878_p10 = por %p4877_p9, %p4876_p8 }
  0x55   :  { %p4879_p11 = pnand %p4878_p10, %p4872_p7 }
  0x57   :  { %4882 = shalt.err (!%p4879_p11)
}
  0x58   :  { %37 = dma.hbm_to_vmem [thread:$0]  %s5845_s0, 256, %s32_s20, [#allocation3], %s5055_s15, %s5055_s15, %s5056_s16  }
  0x59   :  { %s4883_s17 = scalar_lea.hbm %s5847_s2, 256 }
  0x5a   :  { %p4884_p12 = scmp.ne.s32.totalorder %s5847_s2, %s4883_s17  ;;  %p4887_p13 = scmp.lt.u32.totalorder %s4883_s17, %s5847_s2 }
  0x5c   :  { %p4889_p0 = pnand %p4887_p13, %p4884_p12 }
  0x5e   :  { %4892 = shalt.err (!%p4889_p0)
}
  0x5f   :  { %s4893_s21 = scalar_lea.vmem %s5217_s23, 256  ;;  %p4898_p2 = scmp.lt.s32.totalorder %s5217_s23, %s5217_s23 }
  0x60   :  { %p4894_p1 = scmp.ne.s32.totalorder %s5217_s23, %s4893_s21  ;;  %p4899_p3 = scmp.lt.s32.totalorder %s4893_s21, %s4893_s21 }
  0x62   :  { %p4900_p4 = por %p4899_p3, %p4898_p2 }
  0x64   :  { %p4901_p5 = pnand %p4900_p4, %p4894_p1 }
  0x66   :  { %4904 = shalt.err (!%p4901_p5)
}
  0x67   :  { %61 = dma.hbm_to_vmem [thread:$0]  %s5847_s2, 256, %s5217_s23, [#allocation6], %s5055_s15, %s5055_s15, %s5056_s16  }
  0x68   :  { %s5061_s25 = smov [#allocation10]   ;;  %s4905_s27 = scalar_lea.hbm %s5849_s4, 4096 }
  0x69   :  { %s79_s3 = sshll.u32 %s5061_s25, 4  ;;  %p4906_p6 = scmp.ne.s32.totalorder %s5849_s4, %s4905_s27  ;;  %s80_s3 = int_to_ptr.vmem [resolvable:$true] %s79_s3 }
  0x6a   :  { %p4909_p7 = scmp.lt.u32.totalorder %s4905_s27, %s5849_s4 }
  0x6c   :  { %p4911_p8 = pnand %p4909_p7, %p4906_p6 }
  0x6e   :  { %4914 = shalt.err (!%p4911_p8)
}
  0x6f   :  { %s4915_s22 = scalar_lea.vmem %s80_s3, 4096  ;;  %p4920_p10 = scmp.lt.s32.totalorder %s80_s3, %s80_s3 }
  0x70   :  { %p4916_p9 = scmp.ne.s32.totalorder %s80_s3, %s4915_s22  ;;  %p4921_p11 = scmp.lt.s32.totalorder %s4915_s22, %s4915_s22 }
  0x72   :  { %p4922_p12 = por %p4921_p11, %p4920_p10 }
  0x74   :  { %p4923_p13 = pnand %p4922_p12, %p4916_p9 }
  0x76   :  { %4926 = shalt.err (!%p4923_p13)
}
  0x77   :  { %s5062_s2 = smov 256   ;;  %s5063_s23 = smov 16  }
  0x78   :  { %85 = dma.hbm_to_vmem [thread:$0]  %s5849_s4, 4096, %s80_s3, [#allocation9], %s5062_s2, %s5062_s2, %s5063_s23  }
  0x79   :  { %s5064_s17 = smov [#allocation13]   ;;  %s5065_s5 = smov [#allocation16]  }
  0x7a   :  { %s103_s18 = sshll.u32 %s5064_s17, 4  ;;  %s127_s30 = sshll.u32 %s5065_s5, 4  ;;  %s104_s18 = int_to_ptr.vmem [resolvable:$true] %s103_s18  ;;  %s128_s30 = int_to_ptr.vmem [resolvable:$true] %s127_s30 }
  0x7b   :  { %s4927_s0 = scalar_lea.hbm %s5851_s6, 2048 }
  0x7c   :  { %p4928_p0 = scmp.ne.s32.totalorder %s5851_s6, %s4927_s0  ;;  %p4931_p1 = scmp.lt.u32.totalorder %s4927_s0, %s5851_s6 }
  0x7e   :  { %p4933_p2 = pnand %p4931_p1, %p4928_p0 }
  0x80   :  { %4936 = shalt.err (!%p4933_p2)
}
  0x81   :  { %s4937_s4 = scalar_lea.vmem %s104_s18, 2048  ;;  %p4942_p4 = scmp.lt.s32.totalorder %s104_s18, %s104_s18 }
  0x82   :  { %p4938_p3 = scmp.ne.s32.totalorder %s104_s18, %s4937_s4  ;;  %p4943_p5 = scmp.lt.s32.totalorder %s4937_s4, %s4937_s4 }
  0x84   :  { %p4944_p6 = por %p4943_p5, %p4942_p4 }
  0x86   :  { %p4945_p7 = pnand %p4944_p6, %p4938_p3 }
  0x88   :  { %4948 = shalt.err (!%p4945_p7)
}
  0x89   :  { %109 = dma.hbm_to_vmem [thread:$0]  %s5851_s6, 2048, %s104_s18, [#allocation12], %s5055_s15, %s5055_s15, %s5056_s16  }
  0x8a   :  { %s4949_s7 = scalar_lea.hbm %s5853_s8, 8192 }
  0x8b   :  { %p4950_p8 = scmp.ne.s32.totalorder %s5853_s8, %s4949_s7  ;;  %p4953_p9 = scmp.lt.u32.totalorder %s4949_s7, %s5853_s8 }
  0x8d   :  { %p4955_p10 = pnand %p4953_p9, %p4950_p8 }
  0x8f   :  { %4958 = shalt.err (!%p4955_p10)
}
  0x90   :  { %s4959_s13 = scalar_lea.vmem %s128_s30, 8192  ;;  %p4964_p12 = scmp.lt.s32.totalorder %s128_s30, %s128_s30 }
  0x91   :  { %p4960_p11 = scmp.ne.s32.totalorder %s128_s30, %s4959_s13  ;;  %p4965_p13 = scmp.lt.s32.totalorder %s4959_s13, %s4959_s13 }
  0x93   :  { %p4966_p0 = por %p4965_p13, %p4964_p12 }
  0x95   :  { %p4967_p1 = pnand %p4966_p0, %p4960_p11 }
  0x97   :  { %4970 = shalt.err (!%p4967_p1)
}
  0x98   :  { %s5066_s6 = smov 512   ;;  %s5067_s17 = smov 32  }
  0x99   :  { %133 = dma.hbm_to_vmem [thread:$0]  %s5853_s8, 8192, %s128_s30, [#allocation15], %s5066_s6, %s5066_s6, %s5067_s17  }
  0x9a   :  { %s5068_s19 = smov [#allocation17]   ;;  %s4971_s25 = scalar_lea.hbm %s5854_s9, 8192 }
  0x9b   :  { %s139_s21 = sshll.u32 %s5068_s19, 4  ;;  %p4972_p2 = scmp.ne.s32.totalorder %s5854_s9, %s4971_s25  ;;  %s140_s21 = int_to_ptr.vmem [resolvable:$true] %s139_s21 }
  0x9c   :  { %p4975_p3 = scmp.lt.u32.totalorder %s4971_s25, %s5854_s9 }
  0x9e   :  { %p4977_p4 = pnand %p4975_p3, %p4972_p2 }
  0xa0   :  { %4980 = shalt.err (!%p4977_p4)
}
  0xa1   :  { %s4981_s27 = scalar_lea.vmem %s140_s21, 8192  ;;  %p4986_p6 = scmp.lt.s32.totalorder %s140_s21, %s140_s21 }
  0xa2   :  { %p4982_p5 = scmp.ne.s32.totalorder %s140_s21, %s4981_s27  ;;  %p4987_p7 = scmp.lt.s32.totalorder %s4981_s27, %s4981_s27 }
  0xa4   :  { %p4988_p8 = por %p4987_p7, %p4986_p6 }
  0xa6   :  { %p4989_p9 = pnand %p4988_p8, %p4982_p5 }
  0xa8   :  { %4992 = shalt.err (!%p4989_p9)
}
  0xa9   :  { %145 = dma.hbm_to_vmem [thread:$0]  %s5854_s9, 8192, %s140_s21, [#allocation18], %s5055_s15, %s5055_s15, %s5056_s16  }
  0xaa   :  { %5037 = dma.done.wait [#allocation3], 256  }
  0xab   :  { %5038 = vsyncadd [#allocation3], 4294967040 }
  0xac   :  { %5039 = dma.done.wait [#allocation6], 512  }
  0xad   :  { %5040 = vsyncadd [#allocation6], 4294966784 }
  0xae   :  { %5041 = dma.done.wait [#allocation9], 4352  }
  0xaf   :  { %5042 = vsyncadd [#allocation9], 4294962944 }
  0xb0   :  { %5043 = dma.done.wait [#allocation12], 4096  }
  0xb1   :  { %5044 = vsyncadd [#allocation12], 4294963200 }
  0xb2   :  { %5045 = dma.done.wait [#allocation15], 10240  }
  0xb3   :  { %5046 = vsyncadd [#allocation15], 4294957056 }
  0xb4   :  { %5047 = dma.done.wait [#allocation18], 8192  }
  0xb5   :  { %5048 = vsyncadd [#allocation18], 4294959104  ;;  %v5069_v0 = vmov 0.0   ;;  %v295_v1 = vld [vmem:[#allocation11] sm:$0xff]  ;;  %v296_v2 = vld [vmem:[#allocation11 + $0x8] sm:$0xff]  ;;  %vm5070_vm0 = vmmov 0  }
  0xb6   :  { %282 = vmatprep.mubr.f32.mxu0 %v5069_v0  ;;  %v187_v3 = vld [vmem:[#allocation10 + $0x8] sm:$0xff]  ;;  %v4417_v4 = vpack.c.bf16 %v296_v2, %v295_v1  ;;  %v189_v5 = vld [vmem:[#allocation10 + $0x18] sm:$0xff]  ;;  %v186_v6 = vld [vmem:[#allocation10] sm:$0xff]  ;;  %vm581_vm1 = vcmask 130048   ;;  %s5071_s9 = smov 96   ;;  %s5072_s28 = smov 112  }
  0xb7   :  { %v188_v7 = vld [vmem:[#allocation10 + $0x10] sm:$0xff]  ;;  %v4385_v8 = vpack.c.bf16 %v189_v5, %v187_v3  ;;  %v298_v11 = vld [vmem:[#allocation11 + $0x18] sm:$0xff]  ;;  %v191_v12 = vld [vmem:[#allocation10 + $0x28] sm:$0xff]  ;;  %s5073_s1 = smov 80   ;;  %s5074_s7 = smov 64   ;;  %vm1800_vm3 = vcmask 64512  }
  0xb8   :  { %v4387_v9 = vpack.c.bf16 %v188_v7, %v186_v6  ;;  %v297_v10 = vld [vmem:[#allocation11 + $0x10] sm:$0xff]  ;;  %4418 = vmatprep.subr.bf16.mxu1 %v4417_v4  ;;  %v193_v14 = vld [vmem:[#allocation10 + $0x38] sm:$0xff]  ;;  %v190_v15 = vld [vmem:[#allocation10 + $0x20] sm:$0xff]  ;;  %s5075_s14 = smov 48   ;;  %vm3219_vm5 = vcmask 261120   ;;  %vm3222_vm6 = vcmask 392192  }
  0xb9   :  { %v4421_v13 = vpack.c.bf16 %v298_v11, %v297_v10  ;;  %v192_v16 = vld [vmem:[#allocation10 + $0x30] sm:$0xff]  ;;  %4420 = vmatpush3.bf16.msra.mxu1 %v4417_v4  ;;  %4386 = vmatprep.subr.bf16.mxu0 %v4385_v8  ;;  %v4389_v17 = vpack.c.bf16 %v193_v14, %v191_v12  ;;  %v299_v18 = vld [vmem:[#allocation11 + $0x20] sm:$0xff]  ;;  %v300_v19 = vld [vmem:[#allocation11 + $0x28] sm:$0xff]  ;;  %vm3225_vm7 = vcmask 523264   ;;  %vm3228_vm8 = vcmask 654336  }
  0xba   :  { %v195_v20 = vld [vmem:[#allocation10 + $0x48] sm:$0xff]  ;;  %4388 = vmatpush1.bf16.msra.mxu0 %v4387_v9  ;;  %v4391_v21 = vpack.c.bf16 %v192_v16, %v190_v15  ;;  %v4425_v22 = vpack.c.bf16 %v300_v19, %v299_v18  ;;  %v197_v23 = vld [vmem:[#allocation10 + $0x58] sm:$0xff]  ;;  %v194_v24 = vld [vmem:[#allocation10 + $0x40] sm:$0xff]  ;;  %vm3231_vm9 = vcmask 785408   ;;  %vm3234_vm10 = vcmask 916480  }
  0xbb   :  { %4422 = vmatprep.subr.bf16.mxu1 %v4421_v13  ;;  %4390 = vmatprep.subr.bf16.mxu0 %v4389_v17  ;;  %v4393_v25 = vpack.c.bf16 %v197_v23, %v195_v20  ;;  %v196_v26 = vld [vmem:[#allocation10 + $0x50] sm:$0xff]  ;;  %v302_v28 = vld [vmem:[#allocation11 + $0x38] sm:$0xff]  ;;  %v199_v29 = vld [vmem:[#allocation10 + $0x68] sm:$0xff] }
  0xbc   :  { %v301_v27 = vld [vmem:[#allocation11 + $0x30] sm:$0xff]  ;;  %v201_v30 = vld [vmem:[#allocation10 + $0x78] sm:$0xff]  ;;  %v4395_v31 = vpack.c.bf16 %v196_v26, %v194_v24  ;;  %v198_v33 = vld [vmem:[#allocation10 + $0x60] sm:$0xff] }
  0xbd   :  { %4424 = vmatpush3.bf16.msra.mxu1 %v4421_v13  ;;  %v4429_v32 = vpack.c.bf16 %v302_v28, %v301_v27  ;;  %v4397_v34 = vpack.c.bf16 %v201_v30, %v199_v29  ;;  %v200_v35 = vld [vmem:[#allocation10 + $0x70] sm:$0xff]  ;;  %v303_v36 = vld [vmem:[#allocation11 + $0x40] sm:$0xff]  ;;  %v304_v37 = vld [vmem:[#allocation11 + $0x48] sm:$0xff] }
  0xbe   :  { %4392 = vmatpush1.bf16.msra.mxu0 %v4391_v21  ;;  %4426 = vmatprep.subr.bf16.mxu1 %v4425_v22  ;;  %v203_v38 = vld [vmem:[#allocation10 + $0x88] sm:$0xff]  ;;  %v205_v39 = vld [vmem:[#allocation10 + $0x98] sm:$0xff]  ;;  %v4399_v40 = vpack.c.bf16 %v200_v35, %v198_v33  ;;  %v4433_v41 = vpack.c.bf16 %v304_v37, %v303_v36  ;;  %v202_v42 = vld [vmem:[#allocation10 + $0x80] sm:$0xff] }
  0xbf   :  { %4394 = vmatprep.subr.bf16.mxu0 %v4393_v25  ;;  %v4401_v43 = vpack.c.bf16 %v205_v39, %v203_v38  ;;  %v204_v44 = vld [vmem:[#allocation10 + $0x90] sm:$0xff]  ;;  %v306_v46 = vld [vmem:[#allocation11 + $0x58] sm:$0xff]  ;;  %v207_v47 = vld [vmem:[#allocation10 + $0xa8] sm:$0xff] }
  0xc0   :  { %v305_v45 = vld [vmem:[#allocation11 + $0x50] sm:$0xff]  ;;  %v209_v48 = vld [vmem:[#allocation10 + $0xb8] sm:$0xff]  ;;  %v4403_v50 = vpack.c.bf16 %v204_v44, %v202_v42  ;;  %v206_v52 = vld [vmem:[#allocation10 + $0xa0] sm:$0xff] }
  0xc1   :  { %4428 = vmatpush3.bf16.msra.mxu1 %v4425_v22  ;;  %v180_v49 = vld [vmem:[#allocation5] sm:$0xff]  ;;  %v4437_v51 = vpack.c.bf16 %v306_v46, %v305_v45  ;;  %v4405_v53 = vpack.c.bf16 %v209_v48, %v207_v47  ;;  %v307_v55 = vld [vmem:[#allocation11 + $0x60] sm:$0xff]  ;;  %v308_v56 = vld [vmem:[#allocation11 + $0x68] sm:$0xff] }
  0xc2   :  { %4396 = vmatpush1.bf16.msra.mxu0 %v4395_v31  ;;  %4430 = vmatprep.subr.bf16.mxu1 %v4429_v32  ;;  %v208_v54 = vld [vmem:[#allocation10 + $0xb0] sm:$0xff]  ;;  %v211_v57 = vld [vmem:[#allocation10 + $0xc8] sm:$0xff]  ;;  %v213_v58 = vld [vmem:[#allocation10 + $0xd8] sm:$0xff]  ;;  %v4441_v60 = vpack.c.bf16 %v308_v56, %v307_v55 }
  0xc3   :  { %4398 = vmatprep.subr.bf16.mxu0 %v4397_v34  ;;  %4152 = vmatprep.mubr.f32.mxu1 %v180_v49  ;;  %v4407_v59 = vpack.c.bf16 %v208_v54, %v206_v52  ;;  %v210_v61 = vld [vmem:[#allocation10 + $0xc0] sm:$0xff]  ;;  %v4409_v62 = vpack.c.bf16 %v213_v58, %v211_v57  ;;  %v212_v63 = vld [vmem:[#allocation10 + $0xd0] sm:$0xff]  ;;  %v310_v2 = vld [vmem:[#allocation11 + $0x78] sm:$0xff] }
  0xc4   :  { %v309_v1 = vld [vmem:[#allocation11 + $0x70] sm:$0xff]  ;;  %v215_v3 = vld [vmem:[#allocation10 + $0xe8] sm:$0xff]  ;;  %v217_v4 = vld [vmem:[#allocation10 + $0xf8] sm:$0xff]  ;;  %v4411_v5 = vpack.c.bf16 %v212_v63, %v210_v61 }
  0xc5   :  { %4432 = vmatpush3.bf16.msra.mxu1 %v4429_v32  ;;  %v4445_v6 = vpack.c.bf16 %v310_v2, %v309_v1  ;;  %v4413_v7 = vpack.c.bf16 %v217_v4, %v215_v3  ;;  %v214_v8 = vld [vmem:[#allocation10 + $0xe0] sm:$0xff]  ;;  %v216_v9 = vld [vmem:[#allocation10 + $0xf0] sm:$0xff]  ;;  %v387_v11 = vld [vmem:[#allocation13 + $0x8] sm:$0xff] }
  0xc6   :  { %4400 = vmatpush1.bf16.msra.mxu0 %v4399_v40  ;;  %4434 = vmatprep.subr.bf16.mxu1 %v4433_v41  ;;  %v386_v10 = vld [vmem:[#allocation13] sm:$0xff]  ;;  %v4415_v12 = vpack.c.bf16 %v216_v9, %v214_v8  ;;  %v388_v14 = vld [vmem:[#allocation13 + $0x10] sm:$0xff]  ;;  %v389_v15 = vld [vmem:[#allocation13 + $0x18] sm:$0xff] }
  0xc7   :  { %4402 = vmatprep.subr.bf16.mxu0 %v4401_v43  ;;  %v4449_v13 = vpack.c.bf16 %v387_v11, %v386_v10  ;;  %v181_v16 = vld [vmem:[#allocation5 + $0x8] sm:$0xff]  ;;  %v178_v17 = vld [vmem:[#allocation2] sm:$0xff]  ;;  %v4453_v18 = vpack.c.bf16 %v389_v15, %v388_v14  ;;  %v391_v20 = vld [vmem:[#allocation13 + $0x28] sm:$0xff] }
  0xc8   :  { %v390_v19 = vld [vmem:[#allocation13 + $0x20] sm:$0xff]  ;;  %v179_v21 = vld [vmem:[#allocation2 + $0x8] sm:$0xff]  ;;  %v392_v24 = vld [vmem:[#allocation13 + $0x30] sm:$0xff] }
  0xc9   :  { %4436 = vmatpush3.bf16.msra.mxu1 %v4433_v41  ;;  %v4457_v22 = vpack.c.bf16 %v391_v20, %v390_v19  ;;  %v182_v23 = vld [vmem:[#allocation7] sm:$0xff]  ;;  %v393_v25 = vld [vmem:[#allocation13 + $0x38] sm:$0xff]  ;;  %v395_v28 = vld [vmem:[#allocation13 + $0x48] sm:$0xff] }
  0xca   :  { %4404 = vmatpush1.bf16.msra.mxu0 %v4403_v50  ;;  %4438 = vmatprep.subr.bf16.mxu1 %v4437_v51  ;;  %v4461_v26 = vpack.c.bf16 %v393_v25, %v392_v24  ;;  %v394_v27 = vld [vmem:[#allocation13 + $0x40] sm:$0xff]  ;;  %v396_v30 = vld [vmem:[#allocation13 + $0x50] sm:$0xff]  ;;  %v397_v31 = vld [vmem:[#allocation13 + $0x58] sm:$0xff] }
  0xcb   :  { %4406 = vmatprep.subr.bf16.mxu0 %v4405_v53  ;;  %v4465_v29 = vpack.c.bf16 %v395_v28, %v394_v27  ;;  %v4469_v32 = vpack.c.bf16 %v397_v31, %v396_v30  ;;  %v398_v33 = vld [vmem:[#allocation13 + $0x60] sm:$0xff]  ;;  %v399_v34 = vld [vmem:[#allocation13 + $0x68] sm:$0xff]  ;;  %v400_v36 = vld [vmem:[#allocation13 + $0x70] sm:$0xff] }
  0xcc   :  { %v4473_v35 = vpack.c.bf16 %v399_v34, %v398_v33  ;;  %v401_v37 = vld [vmem:[#allocation13 + $0x78] sm:$0xff]  ;;  %v183_v39 = vld [vmem:[#allocation7 + $0x8] sm:$0xff]  ;;  %v184_v14 = vld [vmem:[#allocation8] sm:$0xff] }
  0xcd   :  { %4440 = vmatpush3.bf16.msra.mxu1 %v4437_v51  ;;  %v4477_v38 = vpack.c.bf16 %v401_v37, %v400_v36  ;;  %vm1782_vm2 = vcmp.gt.f32.partialorder %v184_v14, 0.5 }
  0xce   :  { %4408 = vmatpush1.bf16.msra.mxu0 %v4407_v59  ;;  %4442 = vmatprep.subr.bf16.mxu1 %v4441_v60 }
  0xcf   :  { %4410 = vmatprep.subr.bf16.mxu0 %v4409_v62 }
  0xd1   :  { %4444 = vmatpush3.bf16.msra.mxu1 %v4441_v60 }
  0xd2   :  { %4412 = vmatpush1.bf16.msra.mxu0 %v4411_v5  ;;  %4446 = vmatprep.subr.bf16.mxu1 %v4445_v6 }
  0xd3   :  { %4414 = vmatprep.subr.bf16.mxu0 %v4413_v7 }
  0xd5   :  { %4448 = vmatpush3.bf16.msra.mxu1 %v4445_v6 }
  0xd6   :  { %4416 = vmatpush1.bf16.msra.mxu0 %v4415_v12  ;;  %4190 = vmatprep.subr.mxu1 %v5069_v0 }
  0xd7   :  { %4450 = vmatprep.subr.bf16.mxu0 %v4449_v13 }
  0xd8   :  { %4153 = vmatmul.mubr.f32.vlgmr.msra.gmra.mrb[0].mxu1 %v181_v16 }
  0xd9   :  { %283 = vmatmul.mubr.f32.vlgmr.msra.gmra.mrb[0].mxu0 %v178_v17  ;;  %4192 = vmatprep.mubr.msk.f32.mxu1 %vm5070_vm0, %v5069_v0 }
  0xda   :  { %288 = vmatprep.mubr.f32.mxu0 %v5069_v0  ;;  %4452 = vmatpush3.bf16.msra.mxu0 %v4449_v13 }
  0xdb   :  { %4454 = vmatprep.subr.bf16.mxu0 %v4453_v18 }
  0xdd   :  { %289 = vmatmul.mubr.f32.gmra.mrb[2].mxu0 %v179_v21 }
  0xde   :  { %4456 = vmatpush3.bf16.msra.mxu0 %v4453_v18  ;;  %4187 = vmatprep.mubr.f32.mxu0 %v182_v23 }
  0xdf   :  { %4458 = vmatprep.subr.bf16.mxu0 %v4457_v22 }
  0xe2   :  { %4460 = vmatpush3.bf16.msra.mxu0 %v4457_v22 }
  0xe3   :  { %4462 = vmatprep.subr.bf16.mxu0 %v4461_v26 }
  0xe6   :  { %4464 = vmatpush3.bf16.msra.mxu0 %v4461_v26 }
  0xe7   :  { %4466 = vmatprep.subr.bf16.mxu0 %v4465_v29 }
  0xea   :  { %4468 = vmatpush3.bf16.msra.mxu0 %v4465_v29 }
  0xeb   :  { %4470 = vmatprep.subr.bf16.mxu0 %v4469_v32 }
  0xee   :  { %4472 = vmatpush3.bf16.msra.mxu0 %v4469_v32 }
  0xef   :  { %4474 = vmatprep.subr.bf16.mxu0 %v4473_v35 }
  0xf2   :  { %4476 = vmatpush3.bf16.msra.mxu0 %v4473_v35 }
  0xf3   :  { %4478 = vmatprep.subr.bf16.mxu0 %v4477_v38 }
  0xf6   :  { %4480 = vmatpush3.bf16.msra.mxu0 %v4477_v38 }
  0xf7   :  { %4270 = vmatprep.subr.mxu0 %v5069_v0 }
  0xf9   :  { %4188 = vmatmul.mubr.f32.vlgmr.msra.gmra.mrb[4].mxu0 %v183_v39 }
  0xfa   :  { %4272 = vmatprep.mubr.msk.f32.mxu0 %vm5070_vm0, %v5069_v0 }
 0x1ab   :  { %v5318_v40 = vpop.f32.mrb[0].mxu1 }
 0x1ac   :  { %v377_v41 = vpop.f32.mrb[1].mxu1  ;;  %v5320_v42 = vpop.f32.mrb[0].mxu0 }
 0x1ad   :  { %513 = vrot.lane.b32.xlu1 %v377_v41, %s5071_s9  ;;  %509 = vrot.lane.b32.xlu0 %v377_v41, %s5072_s28  ;;  %v286_v43 = vpop.f32.mrb[1].mxu0 }
 0x1ae   :  { %4191 = vmatpush3.xpose.msk.msra.mxu1 %vm581_vm1, %v377_v41 }
 0x1af   :  { %4195 = vmatprep.subr.mxu1 %v5069_v0 }
 0x1b0   :  { %v5326_v44 = vpop.f32.mrb[2].mxu0 }
 0x1b1   :  { %4193 = vmatmul.mubr.msk.f32.vlgmr.msra.gmra.mrb[2].mxu1 %vm581_vm1, %v286_v43  ;;  %483 = vrot.lane.b32.xlu1 %v286_v43, %s5071_s9  ;;  %v5330_v45 = vpop.f32.mrb[3].mxu0 }
 0x1b2   :  { %479 = vrot.lane.b32.xlu0 %v286_v43, %s5072_s28  ;;  %4197 = vmatprep.mubr.msk.f32.mxu1 %vm5070_vm0, %v5069_v0 }
 0x1b5   :  { %487 = vrot.lane.b32.xlu1 %v286_v43, %s5073_s1 }
 0x1b6   :  { %517 = vrot.lane.b32.xlu0 %v377_v41, %s5073_s1 }
 0x1b9   :  { %491 = vrot.lane.b32.xlu1 %v286_v43, %s5074_s7 }
 0x1ba   :  { %521 = vrot.lane.b32.xlu0 %v377_v41, %s5074_s7 }
 0x1bd   :  { %495 = vrot.lane.b32.xlu1 %v286_v43, %s5075_s14 }
 0x1be   :  { %525 = vrot.lane.b32.xlu0 %v377_v41, %s5075_s14 }
 0x1c1   :  { %499 = vrot.lane.b32.xlu1 %v286_v43, %s5067_s17 }
 0x1c2   :  { %529 = vrot.lane.b32.xlu0 %v377_v41, %s5067_s17 }
 0x1c5   :  { %503 = vrot.lane.b32.xlu1 %v286_v43, %s5063_s23 }
 0x1c6   :  { %533 = vrot.lane.b32.xlu0 %v377_v41, %s5063_s23 }
 0x1c9   :  { %481 = vrot.lane.b32.xlu1 %v5330_v45, %s5072_s28 }
 0x1ca   :  { %511 = vrot.lane.b32.xlu0 %v5318_v40, %s5072_s28 }
 0x1cc   :  { %v5367_v46 = vpop.f32.mrb[4].mxu0 }
 0x1cd   :  { %485 = vrot.lane.b32.xlu1 %v5330_v45, %s5071_s9  ;;  %v468_v47 = vpop.f32.mrb[5].mxu0 }
 0x1ce   :  { %515 = vrot.lane.b32.xlu0 %v5318_v40, %s5071_s9  ;;  %4271 = vmatpush3.msra.mxu0 %v468_v47 }
 0x1cf   :  { %4280 = vmatprep.subr.mxu0 %v5069_v0 }
 0x1d1   :  { %489 = vrot.lane.b32.xlu1 %v5330_v45, %s5073_s1 }
 0x1d2   :  { %519 = vrot.lane.b32.xlu0 %v5318_v40, %s5073_s1 }
 0x1d5   :  { %493 = vrot.lane.b32.xlu1 %v5330_v45, %s5074_s7 }
 0x1d6   :  { %523 = vrot.lane.b32.xlu0 %v5318_v40, %s5074_s7 }
 0x1d9   :  { %497 = vrot.lane.b32.xlu1 %v5330_v45, %s5075_s14 }
 0x1da   :  { %527 = vrot.lane.b32.xlu0 %v5318_v40, %s5075_s14 }
 0x1dd   :  { %501 = vrot.lane.b32.xlu1 %v5330_v45, %s5067_s17 }
 0x1de   :  { %531 = vrot.lane.b32.xlu0 %v5318_v40, %s5067_s17 }
 0x1e1   :  { %505 = vrot.lane.b32.xlu1 %v5330_v45, %s5063_s23 }
 0x1e2   :  { %535 = vrot.lane.b32.xlu0 %v5318_v40, %s5063_s23 }
 0x1e5   :  { %539 = vrot.lane.b32.xlu1 %v468_v47, %s5072_s28 }
 0x1e6   :  { %545 = vrot.lane.b32.xlu0 %v468_v47, %s5071_s9 }
 0x1e9   :  { %551 = vrot.lane.b32.xlu1 %v468_v47, %s5073_s1 }
 0x1ea   :  { %575 = vrot.lane.b32.xlu0 %v468_v47, %s5063_s23 }
 0x1ed   :  { %557 = vrot.lane.b32.xlu1 %v468_v47, %s5074_s7 }
 0x1f1   :  { %563 = vrot.lane.b32.xlu1 %v468_v47, %s5075_s14 }
 0x1f5   :  { %569 = vrot.lane.b32.xlu1 %v468_v47, %s5067_s17 }
 0x21f   :  { %v514_v48 = vpop.permute.xlu1 %513  ;;  %v510_v49 = vpop.permute.xlu0 %509 }
 0x220   :  { %4196 = vmatpush3.xpose.msk.msra.mxu1 %vm581_vm1, %v510_v49 }
 0x221   :  { %4200 = vmatprep.subr.mxu1 %v5069_v0 }
 0x223   :  { %v484_v50 = vpop.permute.xlu1 %483 }
 0x224   :  { %v480_v51 = vpop.permute.xlu0 %479 }
 0x225   :  { %4198 = vmatmul.mubr.msk.f32.vlgmr.msra.gmra.mrb[4].mxu1 %vm581_vm1, %v480_v51 }
 0x226   :  { %4201 = vmatpush3.xpose.msk.msra.mxu1 %vm581_vm1, %v514_v48  ;;  %4202 = vmatprep.mubr.msk.f32.mxu1 %vm5070_vm0, %v5069_v0 }
 0x227   :  { %v488_v52 = vpop.permute.xlu1 %487  ;;  %4205 = vmatprep.subr.mxu1 %v5069_v0 }
 0x228   :  { %v518_v53 = vpop.permute.xlu0 %517 }
 0x229   :  { %4203 = vmatmul.mubr.msk.f32.vlgmr.msra.gmra.mrb[6].mxu1 %vm581_vm1, %v484_v50 }
 0x22a   :  { %4206 = vmatpush3.xpose.msk.msra.mxu1 %vm581_vm1, %v518_v53  ;;  %4207 = vmatprep.mubr.msk.f32.mxu1 %vm5070_vm0, %v5069_v0 }
 0x22b   :  { %v492_v54 = vpop.permute.xlu1 %491  ;;  %4210 = vmatprep.subr.mxu1 %v5069_v0 }
 0x22c   :  { %v522_v55 = vpop.permute.xlu0 %521 }
 0x22d   :  { %4208 = vmatmul.mubr.msk.f32.vlgmr.msra.gmra.mrb[8].mxu1 %vm581_vm1, %v488_v52 }
 0x22e   :  { %4211 = vmatpush3.xpose.msk.msra.mxu1 %vm581_vm1, %v522_v55  ;;  %4212 = vmatprep.mubr.msk.f32.mxu1 %vm5070_vm0, %v5069_v0 }
 0x22f   :  { %v496_v56 = vpop.permute.xlu1 %495  ;;  %4215 = vmatprep.subr.mxu1 %v5069_v0 }
 0x230   :  { %v526_v57 = vpop.permute.xlu0 %525 }
 0x231   :  { %4213 = vmatmul.mubr.msk.f32.vlgmr.msra.gmra.mrb[10].mxu1 %vm581_vm1, %v492_v54 }
 0x232   :  { %4216 = vmatpush3.xpose.msk.msra.mxu1 %vm581_vm1, %v526_v57  ;;  %4217 = vmatprep.mubr.msk.f32.mxu1 %vm5070_vm0, %v5069_v0  ;;  %v185_v57 = vld [vmem:[#allocation8 + $0x8] sm:$0xff] }
 0x233   :  { %v500_v58 = vpop.permute.xlu1 %499  ;;  %4220 = vmatprep.subr.mxu1 %v5069_v0  ;;  %vm1783_vm4 = vcmp.gt.f32.partialorder %v185_v57, 0.5 }
 0x234   :  { %v530_v59 = vpop.permute.xlu0 %529 }
 0x235   :  { %4218 = vmatmul.mubr.msk.f32.vlgmr.msra.gmra.mrb[12].mxu1 %vm581_vm1, %v496_v56 }
 0x236   :  { %4221 = vmatpush3.xpose.msk.msra.mxu1 %vm581_vm1, %v530_v59  ;;  %4222 = vmatprep.mubr.msk.f32.mxu1 %vm5070_vm0, %v5069_v0 }
 0x237   :  { %v504_v60 = vpop.permute.xlu1 %503  ;;  %4225 = vmatprep.subr.mxu1 %v5069_v0 }
 0x238   :  { %v534_v61 = vpop.permute.xlu0 %533 }
 0x239   :  { %4223 = vmatmul.mubr.msk.f32.vlgmr.msra.gmra.mrb[14].mxu1 %vm581_vm1, %v500_v58 }
 0x23a   :  { %4226 = vmatpush3.xpose.msk.msra.mxu1 %vm581_vm1, %v534_v61  ;;  %4227 = vmatprep.mubr.msk.f32.mxu1 %vm5070_vm0, %v5069_v0 }
 0x23b   :  { %4230 = vmatprep.subr.mxu1 %v5069_v0  ;;  %v482_v62 = vpop.permute.xlu1 %481 }
 0x23c   :  { %v512_v63 = vpop.permute.xlu0 %511 }
 0x23d   :  { %4228 = vmatmul.mubr.msk.f32.vlgmr.msra.gmra.mrb[16].mxu1 %vm581_vm1, %v504_v60 }
 0x23e   :  { %4231 = vmatpush3.xpose.msk.msra.mxu1 %vm581_vm1, %v5318_v40  ;;  %4232 = vmatprep.mubr.msk.f32.mxu1 %vm5070_vm0, %v5069_v0 }
 0x23f   :  { %4235 = vmatprep.subr.mxu1 %v5069_v0  ;;  %v486_v1 = vpop.permute.xlu1 %485 }
 0x240   :  { %v516_v2 = vpop.permute.xlu0 %515 }
 0x241   :  { %4233 = vmatmul.mubr.msk.f32.vlgmr.msra.gmra.mrb[18].mxu1 %vm581_vm1, %v5330_v45 }
 0x242   :  { %4236 = vmatpush3.xpose.msk.msra.mxu1 %vm581_vm1, %v512_v63  ;;  %4237 = vmatprep.mubr.msk.f32.mxu1 %vm5070_vm0, %v5069_v0 }
 0x243   :  { %v490_v3 = vpop.permute.xlu1 %489  ;;  %4240 = vmatprep.subr.mxu1 %v5069_v0 }
 0x244   :  { %v520_v4 = vpop.permute.xlu0 %519 }
 0x245   :  { %4238 = vmatmul.mubr.msk.f32.vlgmr.msra.gmra.mrb[20].mxu1 %vm581_vm1, %v482_v62 }
 0x246   :  { %4241 = vmatpush3.xpose.msk.msra.mxu1 %vm581_vm1, %v516_v2  ;;  %4242 = vmatprep.mubr.msk.f32.mxu1 %vm5070_vm0, %v5069_v0 }
 0x247   :  { %v494_v5 = vpop.permute.xlu1 %493  ;;  %4245 = vmatprep.subr.mxu1 %v5069_v0 }
 0x248   :  { %v524_v6 = vpop.permute.xlu0 %523 }
 0x249   :  { %4243 = vmatmul.mubr.msk.f32.vlgmr.msra.gmra.mrb[22].mxu1 %vm581_vm1, %v486_v1 }
 0x24a   :  { %4246 = vmatpush3.xpose.msk.msra.mxu1 %vm581_vm1, %v520_v4  ;;  %4247 = vmatprep.mubr.msk.f32.mxu1 %vm5070_vm0, %v5069_v0 }
 0x24b   :  { %4250 = vmatprep.subr.mxu1 %v5069_v0  ;;  %v498_v8 = vpop.permute.xlu1 %497 }
 0x24c   :  { %v528_v7 = vpop.permute.xlu0 %527 }
 0x24d   :  { %4248 = vmatmul.mubr.msk.f32.vlgmr.msra.gmra.mrb[24].mxu1 %vm581_vm1, %v490_v3 }
 0x24e   :  { %4251 = vmatpush3.xpose.msk.msra.mxu1 %vm581_vm1, %v524_v6  ;;  %4252 = vmatprep.mubr.msk.f32.mxu1 %vm5070_vm0, %v5069_v0 }
 0x24f   :  { %4255 = vmatprep.subr.mxu1 %v5069_v0  ;;  %v502_v10 = vpop.permute.xlu1 %501 }
 0x250   :  { %v532_v9 = vpop.permute.xlu0 %531 }
 0x251   :  { %4253 = vmatmul.mubr.msk.f32.vlgmr.msra.gmra.mrb[26].mxu1 %vm581_vm1, %v494_v5 }
 0x252   :  { %4256 = vmatpush3.xpose.msk.msra.mxu1 %vm581_vm1, %v528_v7  ;;  %4257 = vmatprep.mubr.msk.f32.mxu1 %vm5070_vm0, %v5069_v0 }
 0x253   :  { %4260 = vmatprep.subr.mxu1 %v5069_v0  ;;  %v506_v12 = vpop.permute.xlu1 %505 }
 0x254   :  { %v536_v11 = vpop.permute.xlu0 %535 }
 0x255   :  { %4258 = vmatmul.mubr.msk.f32.vlgmr.msra.gmra.mrb[28].mxu1 %vm581_vm1, %v498_v8 }
 0x256   :  { %4261 = vmatpush3.xpose.msk.msra.mxu1 %vm581_vm1, %v532_v9  ;;  %4262 = vmatprep.mubr.msk.f32.mxu1 %vm5070_vm0, %v5069_v0 }
 0x257   :  { %4265 = vmatprep.subr.mxu1 %v5069_v0  ;;  %v540_v13 = vpop.permute.xlu1 %539 }
 0x258   :  { %v5486_v47 = vpop.permute.xlu0 %545 }
 0x259   :  { %4263 = vmatmul.mubr.msk.f32.vlgmr.msra.gmra.mrb[30].mxu1 %vm581_vm1, %v502_v10 }
 0x25a   :  { %4266 = vmatpush3.xpose.msk.msra.mxu1 %vm581_vm1, %v536_v11  ;;  %4267 = vmatprep.mubr.msk.f32.mxu1 %vm5070_vm0, %v5069_v0 }
 0x25b   :  { %4275 = vmatprep.subr.mxu1 %v5069_v0 }
 0x25c   :  { %v5495_v58 = vpop.permute.xlu0 %575 }
 0x25d   :  { %4268 = vmatmul.mubr.msk.f32.vlgmr.msra.gmra.mrb[32].mxu1 %vm581_vm1, %v506_v12 }
 0x25e   :  { %4276 = vmatpush3.msra.mxu1 %v540_v13  ;;  %4277 = vmatprep.mubr.msk.f32.mxu1 %vm5070_vm0, %v5069_v0 }
 0x25f   :  { %4285 = vmatprep.subr.mxu1 %v5069_v0 }
 0x284   :  { %v652_v15 = vpop.f32.mrb[2].mxu1 }
 0x285   :  { %v1766_v16 = vmul.f32 0.25, %v652_v15  ;;  %v4194_v17 = vpop.f32.mrb[3].mxu1 }
 0x287   :  { %v1784_v18 = vsel %vm1782_vm2, -1e+09, %v1766_v16 }
 0x288   :  { %v1801_v19 = vsel %vm1800_vm3, %v1784_v18, -inf }
 0x289   :  { %1802 = vmax.xlane.f32.xlu0 %v1801_v19 }
 0x2f8   :  { %v726_v20 = vpop.f32.mrb[4].mxu1 }
 0x2f9   :  { %v1767_v21 = vmul.f32 0.25, %v726_v20  ;;  %v4199_v22 = vpop.f32.mrb[5].mxu1 }
 0x2fb   :  { %v5464_v23 = vsel %vm1782_vm2, -1e+09, %v1767_v21 }
 0x2fc   :  { %v800_v24 = vpop.f32.mrb[6].mxu1  ;;  %v1804_v25 = vsel %vm1800_vm3, %v5464_v23, -inf }
 0x2fd   :  { %v1768_v26 = vmul.f32 0.25, %v800_v24  ;;  %v4204_v27 = vpop.f32.mrb[7].mxu1  ;;  %1805 = vmax.xlane.f32.xlu1 %v1804_v25 }
 0x2ff   :  { %v5469_v28 = vsel %vm1782_vm2, -1e+09, %v1768_v26 }
 0x300   :  { %v874_v29 = vpop.f32.mrb[8].mxu1  ;;  %v1807_v30 = vsel %vm1800_vm3, %v5469_v28, -inf }
 0x301   :  { %v1769_v31 = vmul.f32 0.25, %v874_v29  ;;  %v4209_v32 = vpop.f32.mrb[9].mxu1  ;;  %1808 = vmax.xlane.f32.xlu0 %v1807_v30 }
 0x303   :  { %v5474_v33 = vsel %vm1782_vm2, -1e+09, %v1769_v31 }
 0x304   :  { %v948_v34 = vpop.f32.mrb[10].mxu1  ;;  %v1810_v35 = vsel %vm1800_vm3, %v5474_v33, -inf }
 0x305   :  { %v1770_v36 = vmul.f32 0.25, %v948_v34  ;;  %v4214_v37 = vpop.f32.mrb[11].mxu1  ;;  %1811 = vmax.xlane.f32.xlu0 %v1810_v35 }
 0x307   :  { %v5479_v38 = vsel %vm1782_vm2, -1e+09, %v1770_v36 }
 0x308   :  { %v1022_v39 = vpop.f32.mrb[12].mxu1  ;;  %v1813_v40 = vsel %vm1800_vm3, %v5479_v38, -inf }
 0x309   :  { %v1771_v41 = vmul.f32 0.25, %v1022_v39  ;;  %v4219_v43 = vpop.f32.mrb[13].mxu1  ;;  %1814 = vmax.xlane.f32.xlu1 %v1813_v40 }
 0x30b   :  { %v5484_v45 = vsel %vm1782_vm2, -1e+09, %v1771_v41 }
 0x30c   :  { %v1096_v48 = vpop.f32.mrb[14].mxu1  ;;  %v1816_v49 = vsel %vm1800_vm3, %v5484_v45, -inf }
 0x30d   :  { %v1772_v50 = vmul.f32 0.25, %v1096_v48  ;;  %v4224_v51 = vpop.f32.mrb[15].mxu1  ;;  %1817 = vmax.xlane.f32.xlu0 %v1816_v49 }
 0x30f   :  { %v5491_v52 = vsel %vm1782_vm2, -1e+09, %v1772_v50 }
 0x310   :  { %v1170_v53 = vpop.f32.mrb[16].mxu1  ;;  %v1819_v54 = vsel %vm1800_vm3, %v5491_v52, -inf }
 0x311   :  { %v1773_v55 = vmul.f32 0.25, %v1170_v53  ;;  %v4229_v56 = vpop.f32.mrb[17].mxu1  ;;  %1820 = vmax.xlane.f32.xlu1 %v1819_v54  ;;  %v5554_v53 = vpop.permute.xlu1 %551 }
 0x313   :  { %v5498_v59 = vsel %vm1782_vm2, -1e+09, %v1773_v55 }
 0x314   :  { %v1244_v60 = vpop.f32.mrb[18].mxu1  ;;  %v1822_v61 = vsel %vm1800_vm3, %v5498_v59, -inf }
 0x315   :  { %v1774_v62 = vmul.f32 0.25, %v1244_v60  ;;  %v4234_v63 = vpop.f32.mrb[19].mxu1  ;;  %1823 = vmax.xlane.f32.xlu0 %v1822_v61  ;;  %v5558_v54 = vpop.permute.xlu1 %557 }
 0x316   :  { %v1803_v1 = vpop.xlane.xlu0 %1802 }
 0x317   :  { %v1849_v2 = vsub.f32 %v1784_v18, %v1803_v1  ;;  %v5503_v3 = vsel %vm1783_vm4, -1e+09, %v1774_v62 }
 0x318   :  { %v1318_v4 = vpop.f32.mrb[20].mxu1  ;;  %v1825_v5 = vsel %vm1800_vm3, %v5503_v3, -inf }
 0x319   :  { %v1865_v6 = vmul.f32 1.442695, %v1849_v2  ;;  %v1775_v7 = vmul.f32 0.25, %v1318_v4  ;;  %v4239_v8 = vpop.f32.mrb[21].mxu1  ;;  %1826 = vmax.xlane.f32.xlu1 %v1825_v5  ;;  %v5560_v55 = vpop.permute.xlu1 %563 }
 0x31b   :  { %4701 = vpow2.f32 %v1865_v6  ;;  %v5508_v9 = vsel %vm1783_vm4, -1e+09, %v1775_v7 }
 0x31c   :  { %v1392_v10 = vpop.f32.mrb[22].mxu1  ;;  %v1828_v11 = vsel %vm1800_vm3, %v5508_v9, -inf }
 0x31d   :  { %v1776_v12 = vmul.f32 0.25, %v1392_v10  ;;  %v4244_v13 = vpop.f32.mrb[23].mxu1  ;;  %1829 = vmax.xlane.f32.xlu0 %v1828_v11  ;;  %v5562_v56 = vpop.permute.xlu1 %569 }
 0x31f   :  { %v5513_v14 = vsel %vm1783_vm4, -1e+09, %v1776_v12 }
 0x320   :  { %v1466_v15 = vpop.f32.mrb[24].mxu1  ;;  %v1831_v16 = vsel %vm1800_vm3, %v5513_v14, -inf }
 0x321   :  { %v1777_v17 = vmul.f32 0.25, %v1466_v15  ;;  %v4249_v18 = vpop.f32.mrb[25].mxu1  ;;  %1832 = vmax.xlane.f32.xlu1 %v1831_v16 }
 0x323   :  { %v5518_v19 = vsel %vm1783_vm4, -1e+09, %v1777_v17 }
 0x324   :  { %v1540_v20 = vpop.f32.mrb[26].mxu1  ;;  %v1834_v21 = vsel %vm1800_vm3, %v5518_v19, -inf }
 0x325   :  { %v5522_v22 = vpop.eup %4701  ;;  %v1778_v24 = vmul.f32 0.25, %v1540_v20  ;;  %v4254_v25 = vpop.f32.mrb[27].mxu1  ;;  %1835 = vmax.xlane.f32.xlu0 %v1834_v21 }
 0x326   :  { %v1897_v26 = vsel %vm1800_vm3, %v5522_v22, 0.0 }
 0x327   :  { %1898 = vadd.xlane.f32.xlu1 %v1897_v26  ;;  %v5527_v27 = vsel %vm1783_vm4, -1e+09, %v1778_v24 }
 0x328   :  { %v1614_v29 = vpop.f32.mrb[28].mxu1  ;;  %v1837_v32 = vsel %vm1800_vm3, %v5527_v27, -inf }
 0x329   :  { %v1779_v30 = vmul.f32 0.25, %v1614_v29  ;;  %v4259_v31 = vpop.f32.mrb[29].mxu1 }
 0x32b   :  { %1838 = vmax.xlane.f32.xlu1 %v1837_v32  ;;  %v5532_v34 = vsel %vm1783_vm4, -1e+09, %v1779_v30 }
 0x32c   :  { %v1688_v35 = vpop.f32.mrb[30].mxu1  ;;  %v1840_v36 = vsel %vm1800_vm3, %v5532_v34, -inf }
 0x32d   :  { %v1780_v37 = vmul.f32 0.25, %v1688_v35  ;;  %v4264_v39 = vpop.f32.mrb[31].mxu1  ;;  %1841 = vmax.xlane.f32.xlu0 %v1840_v36 }
 0x32f   :  { %v5537_v40 = vsel %vm1783_vm4, -1e+09, %v1780_v37 }
 0x330   :  { %v1762_v41 = vpop.f32.mrb[32].mxu1  ;;  %v1843_v43 = vsel %vm1800_vm3, %v5537_v40, -inf }
 0x331   :  { %v1781_v48 = vmul.f32 0.25, %v1762_v41  ;;  %v4269_v49 = vpop.f32.mrb[33].mxu1  ;;  %1844 = vmax.xlane.f32.xlu1 %v1843_v43 }
 0x333   :  { %v5542_v50 = vsel %vm1783_vm4, -1e+09, %v1781_v48 }
 0x334   :  { %v1846_v51 = vsel %vm1800_vm3, %v5542_v50, -inf }
 0x342   :  { %541 = vrot.lane.b32.xlu1 %v5367_v46, %s5072_s28 }
 0x343   :  { %547 = vrot.lane.b32.xlu0 %v5367_v46, %s5071_s9 }
 0x346   :  { %553 = vrot.lane.b32.xlu1 %v5367_v46, %s5073_s1 }
 0x34a   :  { %565 = vrot.lane.b32.xlu1 %v5367_v46, %s5075_s14 }
 0x362   :  { %1847 = vmax.xlane.f32.xlu0 %v1846_v51 }
 0x378   :  { %559 = vrot.lane.b32.xlu0 %v5367_v46, %s5074_s7 }
 0x38a   :  { %v1806_v57 = vpop.xlane.xlu1 %1805 }
 0x38b   :  { %v1850_v60 = vsub.f32 %v5464_v23, %v1806_v57 }
 0x38d   :  { %v1867_v61 = vmul.f32 1.442695, %v1850_v60 }
 0x38e   :  { %v1809_v62 = vpop.xlane.xlu0 %1808 }
 0x38f   :  { %4703 = vpow2.f32 %v1867_v61  ;;  %v1851_v63 = vsub.f32 %v5469_v28, %v1809_v62 }
 0x391   :  { %v1869_v1 = vmul.f32 1.442695, %v1851_v63 }
 0x392   :  { %v1812_v2 = vpop.xlane.xlu0 %1811 }
 0x393   :  { %4705 = vpow2.f32 %v1869_v1  ;;  %v1852_v4 = vsub.f32 %v5474_v33, %v1812_v2 }
 0x395   :  { %v1871_v5 = vmul.f32 1.442695, %v1852_v4 }
 0x396   :  { %v1815_v6 = vpop.xlane.xlu1 %1814 }
 0x397   :  { %4707 = vpow2.f32 %v1871_v5  ;;  %v1853_v7 = vsub.f32 %v5479_v38, %v1815_v6 }
 0x399   :  { %v5568_v8 = vpop.eup %4703  ;;  %v1873_v10 = vmul.f32 1.442695, %v1853_v7 }
 0x39a   :  { %v1818_v11 = vpop.xlane.xlu0 %1817  ;;  %v1900_v23 = vsel %vm1800_vm3, %v5568_v8, 0.0 }
 0x39b   :  { %4709 = vpow2.f32 %v1873_v10  ;;  %v1854_v28 = vsub.f32 %v5484_v45, %v1818_v11  ;;  %1901 = vadd.xlane.f32.xlu0 %v1900_v23 }
 0x39d   :  { %v5573_v12 = vpop.eup %4705  ;;  %v1875_v13 = vmul.f32 1.442695, %v1854_v28 }
 0x39e   :  { %v1821_v33 = vpop.xlane.xlu1 %1820  ;;  %v1903_v15 = vsel %vm1800_vm3, %v5573_v12, 0.0 }
 0x39f   :  { %4711 = vpow2.f32 %v1875_v13  ;;  %v1855_v38 = vsub.f32 %v5491_v52, %v1821_v33  ;;  %1904 = vadd.xlane.f32.xlu1 %v1903_v15 }
 0x3a1   :  { %v5578_v16 = vpop.eup %4707  ;;  %v1877_v17 = vmul.f32 1.442695, %v1855_v38 }
 0x3a2   :  { %v1824_v18 = vpop.xlane.xlu0 %1823  ;;  %v1906_v20 = vsel %vm1800_vm3, %v5578_v16, 0.0 }
 0x3a3   :  { %4713 = vpow2.f32 %v1877_v17  ;;  %v1856_v45 = vsub.f32 %v5498_v59, %v1824_v18  ;;  %1907 = vadd.xlane.f32.xlu0 %v1906_v20 }
 0x3a5   :  { %v5583_v21 = vpop.eup %4709  ;;  %v1879_v24 = vmul.f32 1.442695, %v1856_v45 }
 0x3a6   :  { %v1827_v25 = vpop.xlane.xlu1 %1826  ;;  %v1909_v26 = vsel %vm1800_vm3, %v5583_v21, 0.0 }
 0x3a7   :  { %4715 = vpow2.f32 %v1879_v24  ;;  %v1857_v52 = vsub.f32 %v5503_v3, %v1827_v25  ;;  %1910 = vadd.xlane.f32.xlu1 %v1909_v26 }
 0x3a9   :  { %v5588_v29 = vpop.eup %4711  ;;  %v1881_v30 = vmul.f32 1.442695, %v1857_v52 }
 0x3aa   :  { %v1830_v31 = vpop.xlane.xlu0 %1829  ;;  %v1912_v32 = vsel %vm1800_vm3, %v5588_v29, 0.0 }
 0x3ab   :  { %4717 = vpow2.f32 %v1881_v30  ;;  %v1858_v59 = vsub.f32 %v5508_v9, %v1830_v31  ;;  %1913 = vadd.xlane.f32.xlu0 %v1912_v32 }
 0x3ad   :  { %v5593_v35 = vpop.eup %4713  ;;  %v1883_v36 = vmul.f32 1.442695, %v1858_v59 }
 0x3ae   :  { %v1833_v37 = vpop.xlane.xlu1 %1832  ;;  %v1915_v39 = vsel %vm1800_vm3, %v5593_v35, 0.0 }
 0x3af   :  { %4719 = vpow2.f32 %v1883_v36  ;;  %v1859_v3 = vsub.f32 %v5513_v14, %v1833_v37  ;;  %1916 = vadd.xlane.f32.xlu1 %v1915_v39 }
 0x3b1   :  { %v5598_v41 = vpop.eup %4715  ;;  %v1885_v43 = vmul.f32 1.442695, %v1859_v3 }
 0x3b2   :  { %v1836_v48 = vpop.xlane.xlu0 %1835  ;;  %v1918_v49 = vsel %vm1800_vm3, %v5598_v41, 0.0 }
 0x3b3   :  { %4721 = vpow2.f32 %v1885_v43  ;;  %v1860_v9 = vsub.f32 %v5518_v19, %v1836_v48  ;;  %1919 = vadd.xlane.f32.xlu0 %v1918_v49 }
 0x3b4   :  { %v1899_v51 = vpop.xlane.xlu1 %1898 }
 0x3b5   :  { %v5603_v57 = vpop.eup %4717  ;;  %v1887_v60 = vmul.f32 1.442695, %v1860_v9  ;;  %4723 = vrcp.f32 %v1899_v51 }
 0x3b6   :  { %v1921_v14 = vsel %vm1800_vm3, %v5603_v57, 0.0 }
 0x3b7   :  { %4725 = vpow2.f32 %v1887_v60  ;;  %1922 = vadd.xlane.f32.xlu1 %v1921_v14 }
 0x3b8   :  { %v1839_v61 = vpop.xlane.xlu1 %1838 }
 0x3b9   :  { %v5607_v62 = vpop.eup %4719  ;;  %v1861_v63 = vsub.f32 %v5527_v27, %v1839_v61 }
 0x3ba   :  { %v1842_v1 = vpop.xlane.xlu0 %1841  ;;  %v1924_v19 = vsel %vm1800_vm3, %v5607_v62, 0.0 }
 0x3bb   :  { %v1889_v2 = vmul.f32 1.442695, %v1861_v63  ;;  %v1862_v4 = vsub.f32 %v5532_v34, %v1842_v1  ;;  %1925 = vadd.xlane.f32.xlu0 %v1924_v19 }
 0x3bd   :  { %v5613_v5 = vpop.eup %4721  ;;  %4727 = vpow2.f32 %v1889_v2  ;;  %v1891_v6 = vmul.f32 1.442695, %v1862_v4 }
 0x3be   :  { %v1845_v7 = vpop.xlane.xlu1 %1844  ;;  %v1927_v10 = vsel %vm1800_vm3, %v5613_v5, 0.0  ;;  %v5643_v17 = vpop.permute.xlu0 %547 }
 0x3bf   :  { %v4724_v11 = vpop.eup %4723  ;;  %4729 = vpow2.f32 %v1891_v6  ;;  %v1863_v27 = vsub.f32 %v5537_v40, %v1845_v7  ;;  %1928 = vadd.xlane.f32.xlu1 %v1927_v10 }
 0x3c0   :  { %v1946_v23 = vmul.f32 %v4724_v11, %v5522_v22 }
 0x3c1   :  { %v5619_v28 = vpop.eup %4725  ;;  %v1893_v13 = vmul.f32 1.442695, %v1863_v27 }
 0x3c2   :  { %1977 = vst.msk [vmem:[#allocation20] sm:$0xff] %vm1800_vm3, %v1946_v23  ;;  %4273 = vmatmul.mubr.msk.f32.vlgmr.msra.gmra.mrb[6].mxu0 %vm1800_vm3, %v1946_v23  ;;  %v1930_v34 = vsel %vm1800_vm3, %v5619_v28, 0.0  ;;  %v5652_v26 = vpop.permute.xlu1 %541 }
 0x3c3   :  { %4731 = vpow2.f32 %v1893_v13  ;;  %4281 = vmatpush3.msra.mxu0 %v5486_v47  ;;  %1931 = vadd.xlane.f32.xlu0 %v1930_v34 }
 0x3c4   :  { %4282 = vmatprep.mubr.msk.f32.mxu0 %vm5070_vm0, %v5069_v0  ;;  %4290 = vmatprep.subr.mxu0 %v5069_v0 }
 0x3c6   :  { %v5654_v52 = vpop.permute.xlu1 %553 }
 0x3c7   :  { %v5629_v22 = vpop.eup %4727 }
 0x3c8   :  { %v1933_v40 = vsel %vm1800_vm3, %v5629_v22, 0.0 }
 0x3c9   :  { %v5633_v33 = vpop.eup %4729  ;;  %1934 = vadd.xlane.f32.xlu1 %v1933_v40 }
 0x3ca   :  { %v1936_v15 = vsel %vm1800_vm3, %v5633_v33, 0.0  ;;  %v5658_v31 = vpop.permute.xlu1 %565 }
 0x3cb   :  { %1937 = vadd.xlane.f32.xlu0 %v1936_v15 }
 0x3cd   :  { %v5637_v38 = vpop.eup %4731 }
 0x3ce   :  { %v1939_v47 = vsel %vm1800_vm3, %v5637_v38, 0.0 }
 0x3cf   :  { %1940 = vadd.xlane.f32.xlu0 %v1939_v47 }
 0x3da   :  { %577 = vrot.lane.b32.xlu1 %v5367_v46, %s5063_s23 }
 0x3ef   :  { %v1848_v18 = vpop.xlane.xlu0 %1847 }
 0x3f0   :  { %v1864_v20 = vsub.f32 %v5542_v50, %v1848_v18 }
 0x3f2   :  { %v1895_v45 = vmul.f32 1.442695, %v1864_v20 }
 0x3f3   :  { %v5656_v30 = vpop.permute.xlu0 %559 }
 0x3f4   :  { %4733 = vpow2.f32 %v1895_v45 }
 0x3fe   :  { %v5646_v24 = vpop.eup %4733 }
 0x3ff   :  { %v1942_v25 = vsel %vm1800_vm3, %v5646_v24, 0.0 }
 0x400   :  { %1943 = vadd.xlane.f32.xlu0 %v1942_v25 }
 0x416   :  { %571 = vrot.lane.b32.xlu0 %v5367_v46, %s5067_s17 }
 0x428   :  { %v1902_v50 = vpop.xlane.xlu0 %1901 }
 0x429   :  { %4735 = vrcp.f32 %v1902_v50 }
 0x42c   :  { %v1905_v32 = vpop.xlane.xlu1 %1904 }
 0x42d   :  { %4737 = vrcp.f32 %v1905_v32 }
 0x430   :  { %v1908_v59 = vpop.xlane.xlu0 %1907 }
 0x431   :  { %4739 = vrcp.f32 %v1908_v59 }
 0x433   :  { %v4736_v36 = vpop.eup %4735 }
 0x434   :  { %v1948_v37 = vmul.f32 %v4736_v36, %v5568_v8  ;;  %v1911_v39 = vpop.xlane.xlu1 %1910 }
 0x435   :  { %4741 = vrcp.f32 %v1911_v39 }
 0x436   :  { %1978 = vst.msk [vmem:[#allocation20 + $0x8] sm:$0xff] %vm1800_vm3, %v1948_v37  ;;  %4278 = vmatmul.mubr.msk.f32.vlgmr.msra.gmra.mrb[34].mxu1 %vm1800_vm3, %v1948_v37 }
 0x437   :  { %v4738_v3 = vpop.eup %4737  ;;  %4286 = vmatpush3.msra.mxu1 %v5554_v53  ;;  %4287 = vmatprep.mubr.msk.f32.mxu1 %vm5070_vm0, %v5069_v0 }
 0x438   :  { %v1950_v43 = vmul.f32 %v4738_v3, %v5573_v12  ;;  %v1914_v48 = vpop.xlane.xlu0 %1913  ;;  %4295 = vmatprep.subr.mxu1 %v5069_v0 }
 0x439   :  { %4743 = vrcp.f32 %v1914_v48 }
 0x43a   :  { %1979 = vst.msk [vmem:[#allocation20 + $0x10] sm:$0xff] %vm1800_vm3, %v1950_v43  ;;  %4283 = vmatmul.mubr.msk.f32.vlgmr.msra.gmra.mrb[8].mxu0 %vm1800_vm3, %v1950_v43 }
 0x43b   :  { %v4740_v8 = vpop.eup %4739  ;;  %4291 = vmatpush3.msra.mxu0 %v5558_v54  ;;  %4292 = vmatprep.mubr.msk.f32.mxu0 %vm5070_vm0, %v5069_v0 }
 0x43c   :  { %v1952_v53 = vmul.f32 %v4740_v8, %v5578_v16  ;;  %v1917_v49 = vpop.xlane.xlu1 %1916  ;;  %4300 = vmatprep.subr.mxu0 %v5069_v0 }
 0x43d   :  { %4745 = vrcp.f32 %v1917_v49  ;;  %v3238_v49 = vld [vmem:[#allocation14] sm:$0xff] }
 0x43e   :  { %1980 = vst.msk [vmem:[#allocation20 + $0x18] sm:$0xff] %vm1800_vm3, %v1952_v53  ;;  %4288 = vmatmul.mubr.msk.f32.vlgmr.msra.gmra.mrb[36].mxu1 %vm1800_vm3, %v1952_v53 }
 0x43f   :  { %v4742_v12 = vpop.eup %4741  ;;  %4296 = vmatpush3.msra.mxu1 %v5560_v55  ;;  %4297 = vmatprep.mubr.msk.f32.mxu1 %vm5070_vm0, %v5069_v0 }
 0x440   :  { %v1954_v54 = vmul.f32 %v4742_v12, %v5583_v21  ;;  %v1920_v9 = vpop.xlane.xlu0 %1919  ;;  %4305 = vmatprep.subr.mxu1 %v5069_v0  ;;  %v3239_v12 = vld [vmem:[#allocation14 + $0x8] sm:$0xff] }
 0x441   :  { %4747 = vrcp.f32 %v1920_v9 }
 0x442   :  { %1981 = vst.msk [vmem:[#allocation20 + $0x20] sm:$0xff] %vm1800_vm3, %v1954_v54  ;;  %4293 = vmatmul.mubr.msk.f32.vlgmr.msra.gmra.mrb[10].mxu0 %vm1800_vm3, %v1954_v54  ;;  %v3240_v54 = vld [vmem:[#allocation14 + $0x10] sm:$0xff] }
 0x443   :  { %v4744_v16 = vpop.eup %4743  ;;  %4301 = vmatpush3.msra.mxu0 %v5562_v56  ;;  %4302 = vmatprep.mubr.msk.f32.mxu0 %vm5070_vm0, %v5069_v0 }
 0x444   :  { %v1956_v55 = vmul.f32 %v4744_v16, %v5588_v29  ;;  %v1923_v51 = vpop.xlane.xlu1 %1922  ;;  %4310 = vmatprep.subr.mxu0 %v5069_v0 }
 0x445   :  { %4749 = vrcp.f32 %v1923_v51  ;;  %v3241_v51 = vld [vmem:[#allocation14 + $0x18] sm:$0xff] }
 0x446   :  { %1982 = vst.msk [vmem:[#allocation20 + $0x28] sm:$0xff] %vm1800_vm3, %v1956_v55  ;;  %4298 = vmatmul.mubr.msk.f32.vlgmr.msra.gmra.mrb[38].mxu1 %vm1800_vm3, %v1956_v55  ;;  %v4481_v55 = vpack.c.bf16 %v3239_v12, %v3238_v49 }
 0x447   :  { %v4746_v21 = vpop.eup %4745  ;;  %4306 = vmatpush3.msra.mxu1 %v5495_v58  ;;  %4307 = vmatprep.mubr.msk.f32.mxu1 %vm5070_vm0, %v5069_v0 }
 0x448   :  { %v1958_v56 = vmul.f32 %v4746_v21, %v5593_v35  ;;  %v1926_v60 = vpop.xlane.xlu0 %1925  ;;  %4315 = vmatprep.subr.mxu1 %v5069_v0  ;;  %v4485_v21 = vpack.c.bf16 %v3241_v51, %v3240_v54 }
 0x449   :  { %4751 = vrcp.f32 %v1926_v60  ;;  %v3243_v60 = vld [vmem:[#allocation14 + $0x28] sm:$0xff] }
 0x44a   :  { %1983 = vst.msk [vmem:[#allocation20 + $0x30] sm:$0xff] %vm1800_vm3, %v1958_v56  ;;  %4303 = vmatmul.mubr.msk.f32.vlgmr.msra.gmra.mrb[12].mxu0 %vm1800_vm3, %v1958_v56  ;;  %v3242_v56 = vld [vmem:[#allocation14 + $0x20] sm:$0xff] }
 0x44b   :  { %v4748_v29 = vpop.eup %4747  ;;  %4311 = vmatpush3.msra.mxu0 %v5367_v46  ;;  %4312 = vmatprep.mubr.msk.f32.mxu0 %vm5070_vm0, %v5069_v0 }
 0x44c   :  { %v1960_v58 = vmul.f32 %v4748_v29, %v5598_v41  ;;  %v1929_v14 = vpop.xlane.xlu1 %1928  ;;  %4320 = vmatprep.subr.mxu0 %v5069_v0  ;;  %v4489_v29 = vpack.c.bf16 %v3243_v60, %v3242_v56 }
 0x44d   :  { %4753 = vrcp.f32 %v1929_v14  ;;  %v3244_v14 = vld [vmem:[#allocation14 + $0x30] sm:$0xff] }
 0x44e   :  { %1984 = vst.msk [vmem:[#allocation20 + $0x38] sm:$0xff] %vm1800_vm3, %v1960_v58  ;;  %4308 = vmatmul.mubr.msk.f32.vlgmr.msra.gmra.mrb[40].mxu1 %vm1800_vm3, %v1960_v58 }
 0x44f   :  { %v4750_v35 = vpop.eup %4749  ;;  %4316 = vmatpush3.msra.mxu1 %v5652_v26  ;;  %4317 = vmatprep.mubr.msk.f32.mxu1 %vm5070_vm0, %v5069_v0 }
 0x450   :  { %v1962_v46 = vmul.f32 %v4750_v35, %v5603_v57  ;;  %v1932_v61 = vpop.xlane.xlu0 %1931  ;;  %4325 = vmatprep.subr.mxu1 %v5069_v0  ;;  %v3245_v35 = vld [vmem:[#allocation14 + $0x38] sm:$0xff] }
 0x451   :  { %4755 = vrcp.f32 %v1932_v61 }
 0x452   :  { %1985 = vst.msk [vmem:[#allocation20 + $0x40] sm:$0xff] %vm1800_vm3, %v1962_v46  ;;  %4313 = vmatmul.mubr.msk.f32.vlgmr.msra.gmra.mrb[14].mxu0 %vm1800_vm3, %v1962_v46 }
 0x453   :  { %v4752_v41 = vpop.eup %4751  ;;  %4321 = vmatpush3.msra.mxu0 %v5643_v17  ;;  %4322 = vmatprep.mubr.msk.f32.mxu0 %vm5070_vm0, %v5069_v0 }
 0x454   :  { %v1964_v63 = vmul.f32 %v4752_v41, %v5607_v62  ;;  %4330 = vmatprep.subr.mxu0 %v5069_v0 }
 0x456   :  { %1986 = vst.msk [vmem:[#allocation20 + $0x48] sm:$0xff] %vm1800_vm3, %v1964_v63  ;;  %4318 = vmatmul.mubr.msk.f32.vlgmr.msra.gmra.mrb[42].mxu1 %vm1800_vm3, %v1964_v63  ;;  %v1935_v57 = vpop.xlane.xlu1 %1934 }
 0x457   :  { %v4754_v1 = vpop.eup %4753  ;;  %4326 = vmatpush3.msra.mxu1 %v5654_v52  ;;  %4757 = vrcp.f32 %v1935_v57  ;;  %4327 = vmatprep.mubr.msk.f32.mxu1 %vm5070_vm0, %v5069_v0 }
 0x458   :  { %v1966_v19 = vmul.f32 %v4754_v1, %v5613_v5  ;;  %v1938_v2 = vpop.xlane.xlu0 %1937  ;;  %4335 = vmatprep.subr.mxu1 %v5069_v0  ;;  %v4493_v1 = vpack.c.bf16 %v3245_v35, %v3244_v14 }
 0x459   :  { %4759 = vrcp.f32 %v1938_v2  ;;  %v3247_v2 = vld [vmem:[#allocation14 + $0x48] sm:$0xff] }
 0x45a   :  { %1987 = vst.msk [vmem:[#allocation20 + $0x50] sm:$0xff] %vm1800_vm3, %v1966_v19  ;;  %4323 = vmatmul.mubr.msk.f32.vlgmr.msra.gmra.mrb[16].mxu0 %vm1800_vm3, %v1966_v19  ;;  %v578_v27 = vpop.permute.xlu1 %577  ;;  %v3246_v19 = vld [vmem:[#allocation14 + $0x40] sm:$0xff] }
 0x45b   :  { %v4756_v62 = vpop.eup %4755  ;;  %4331 = vmatpush3.msra.mxu0 %v5656_v30  ;;  %4332 = vmatprep.mubr.msk.f32.mxu0 %vm5070_vm0, %v5069_v0 }
 0x45c   :  { %v1968_v4 = vmul.f32 %v4756_v62, %v5619_v28  ;;  %v1941_v6 = vpop.xlane.xlu0 %1940  ;;  %4340 = vmatprep.subr.mxu0 %v5069_v0  ;;  %v4497_v62 = vpack.c.bf16 %v3247_v2, %v3246_v19  ;;  %v3371_v19 = vld [vmem:[#allocation16 + $0x38] sm:$0xff]  ;;  %v3364_v2 = vld [vmem:[#allocation16] sm:$0xff] }
 0x45d   :  { %4761 = vrcp.f32 %v1941_v6  ;;  %v3249_v6 = vld [vmem:[#allocation14 + $0x58] sm:$0xff] }
 0x45e   :  { %1988 = vst.msk [vmem:[#allocation20 + $0x58] sm:$0xff] %vm1800_vm3, %v1968_v4  ;;  %4328 = vmatmul.mubr.msk.f32.vlgmr.msra.gmra.mrb[44].mxu1 %vm1800_vm3, %v1968_v4  ;;  %v3248_v4 = vld [vmem:[#allocation14 + $0x50] sm:$0xff] }
 0x45f   :  { %4336 = vmatpush3.msra.mxu1 %v5658_v31  ;;  %4337 = vmatprep.mubr.msk.f32.mxu1 %vm5070_vm0, %v5069_v0 }
 0x460   :  { %4345 = vmatprep.subr.mxu1 %v5069_v0 }
 0x461   :  { %v4758_v5 = vpop.eup %4757 }
 0x462   :  { %v1970_v7 = vmul.f32 %v4758_v5, %v5629_v22  ;;  %v4501_v5 = vpack.c.bf16 %v3249_v6, %v3248_v4 }
 0x463   :  { %v4760_v10 = vpop.eup %4759 }
 0x464   :  { %1989 = vst.msk [vmem:[#allocation20 + $0x60] sm:$0xff] %vm1800_vm3, %v1970_v7  ;;  %v1972_v11 = vmul.f32 %v4760_v10, %v5633_v33  ;;  %4333 = vmatmul.mubr.msk.f32.vlgmr.msra.gmra.mrb[18].mxu0 %vm1800_vm3, %v1970_v7  ;;  %v3250_v7 = vld [vmem:[#allocation14 + $0x60] sm:$0xff]  ;;  %v3251_v10 = vld [vmem:[#allocation14 + $0x68] sm:$0xff] }
 0x465   :  { %4342 = vmatprep.mubr.msk.f32.mxu0 %vm5070_vm0, %v5069_v0 }
 0x466   :  { %1990 = vst.msk [vmem:[#allocation20 + $0x68] sm:$0xff] %vm1800_vm3, %v1972_v11  ;;  %4338 = vmatmul.mubr.msk.f32.vlgmr.msra.gmra.mrb[46].mxu1 %vm1800_vm3, %v1972_v11  ;;  %v4505_v11 = vpack.c.bf16 %v3251_v10, %v3250_v7  ;;  %v3370_v7 = vld [vmem:[#allocation16 + $0x30] sm:$0xff]  ;;  %v3373_v10 = vld [vmem:[#allocation16 + $0x48] sm:$0xff] }
 0x467   :  { %v4762_v23 = vpop.eup %4761  ;;  %4346 = vmatpush3.msra.mxu1 %v578_v27  ;;  %4347 = vmatprep.mubr.msk.f32.mxu1 %vm5070_vm0, %v5069_v0  ;;  %v3252_v27 = vld [vmem:[#allocation14 + $0x70] sm:$0xff] }
 0x468   :  { %v1974_v28 = vmul.f32 %v4762_v23, %v5637_v38  ;;  %v3253_v23 = vld [vmem:[#allocation14 + $0x78] sm:$0xff] }
 0x46a   :  { %1991 = vst.msk [vmem:[#allocation20 + $0x70] sm:$0xff] %vm1800_vm3, %v1974_v28 }
 0x48d   :  { %v1944_v13 = vpop.xlane.xlu0 %1943 }
 0x48e   :  { %4763 = vrcp.f32 %v1944_v13 }
 0x491   :  { %v572_v34 = vpop.permute.xlu0 %571 }
 0x492   :  { %4341 = vmatpush3.msra.mxu0 %v572_v34 }
 0x493   :  { %4343 = vmatmul.mubr.msk.f32.vlgmr.msra.gmra.mrb[20].mxu0 %vm1800_vm3, %v1974_v28  ;;  %4482 = vmatprep.subr.bf16.mxu0 %v4481_v55  ;;  %v4509_v28 = vpack.c.bf16 %v3253_v23, %v3252_v27  ;;  %v3375_v27 = vld [vmem:[#allocation16 + $0x58] sm:$0xff] }
 0x494   :  { %4484 = vmatpush3.bf16.msra.mxu0 %v4481_v55  ;;  %v3379_v23 = vld [vmem:[#allocation16 + $0x78] sm:$0xff] }
 0x495   :  { %v5750_v22 = vpop.f32.mrb[6].mxu0  ;;  %4486 = vmatprep.subr.bf16.mxu0 %v4485_v21 }
 0x496   :  { %v4274_v40 = vpop.f32.mrb[7].mxu0 }
 0x498   :  { %v4764_v33 = vpop.eup %4763  ;;  %4488 = vmatpush3.bf16.msra.mxu0 %v4485_v21 }
 0x499   :  { %v1976_v15 = vmul.f32 %v4764_v33, %v5646_v24  ;;  %4490 = vmatprep.subr.bf16.mxu0 %v4489_v29 }
 0x49b   :  { %1992 = vst.msk [vmem:[#allocation20 + $0x78] sm:$0xff] %vm1800_vm3, %v1976_v15  ;;  %4348 = vmatmul.mubr.msk.f32.vlgmr.msra.gmra.mrb[48].mxu1 %vm1800_vm3, %v1976_v15 }
 0x49c   :  { %3492 = vmatprep.mubr.f32.mxu1 %v5069_v0  ;;  %4492 = vmatpush3.bf16.msra.mxu0 %v4489_v29 }
 0x49d   :  { %4494 = vmatprep.subr.bf16.mxu0 %v4493_v1 }
 0x4a0   :  { %4496 = vmatpush3.bf16.msra.mxu0 %v4493_v1 }
 0x4a1   :  { %4498 = vmatprep.subr.bf16.mxu0 %v4497_v62 }
 0x4a4   :  { %4500 = vmatpush3.bf16.msra.mxu0 %v4497_v62  ;;  %v3368_v62 = vld [vmem:[#allocation16 + $0x20] sm:$0xff] }
 0x4a5   :  { %4502 = vmatprep.subr.bf16.mxu0 %v4501_v5  ;;  %v4515_v6 = vpack.c.bf16 %v3368_v62, %v3364_v2  ;;  %v3409_v62 = vld [vmem:[#allocation16 + $0x168] sm:$0xff] }
 0x4a8   :  { %4504 = vmatpush3.bf16.msra.mxu0 %v4501_v5  ;;  %v3366_v5 = vld [vmem:[#allocation16 + $0x10] sm:$0xff] }
 0x4a9   :  { %4506 = vmatprep.subr.bf16.mxu0 %v4505_v11 }
 0x4ac   :  { %4508 = vmatpush3.bf16.msra.mxu0 %v4505_v11  ;;  %v4547_v11 = vpack.c.bf16 %v3370_v7, %v3366_v5 }
 0x4ad   :  { %4510 = vmatprep.subr.bf16.mxu0 %v4509_v28 }
 0x4b0   :  { %4512 = vmatpush3.bf16.msra.mxu0 %v4509_v28  ;;  %v4549_v28 = vpack.c.bf16 %v3379_v23, %v3375_v27  ;;  %v3410_v23 = vld [vmem:[#allocation16 + $0x170] sm:$0xff] }
 0x509   :  { %v2135_v38 = vpop.f32.mrb[34].mxu1 }
 0x50a   :  { %v4279_v47 = vpop.f32.mrb[35].mxu1 }
 0x50d   :  { %v2208_v17 = vpop.f32.mrb[8].mxu0 }
 0x50e   :  { %v4284_v18 = vpop.f32.mrb[9].mxu0 }
 0x511   :  { %v2281_v20 = vpop.f32.mrb[36].mxu1 }
 0x512   :  { %v4289_v45 = vpop.f32.mrb[37].mxu1 }
 0x515   :  { %v2354_v25 = vpop.f32.mrb[10].mxu0 }
 0x516   :  { %v4294_v26 = vpop.f32.mrb[11].mxu0 }
 0x519   :  { %v2427_v52 = vpop.f32.mrb[38].mxu1 }
 0x51a   :  { %v4299_v30 = vpop.f32.mrb[39].mxu1 }
 0x51d   :  { %v5756_v31 = vpop.f32.mrb[12].mxu0 }
 0x51e   :  { %v4304_v50 = vpop.f32.mrb[13].mxu0 }
 0x521   :  { %v5758_v24 = vpop.f32.mrb[40].mxu1 }
 0x522   :  { %v4309_v32 = vpop.f32.mrb[41].mxu1 }
 0x525   :  { %v5760_v59 = vpop.f32.mrb[14].mxu0 }
 0x526   :  { %v4314_v36 = vpop.f32.mrb[15].mxu0 }
 0x529   :  { %v2719_v37 = vpop.f32.mrb[42].mxu1 }
 0x52a   :  { %v4666_v39 = vpack.i.bf16 %v2719_v37, %v2135_v38  ;;  %v4319_v3 = vpop.f32.mrb[43].mxu1 }
 0x52c   :  { %4667 = vrot.lane.b32.xlu0 %v4666_v39, %s5063_s23 }
 0x52d   :  { %v2792_v43 = vpop.f32.mrb[16].mxu0 }
 0x52e   :  { %v4671_v48 = vpack.i.bf16 %v2792_v43, %v2208_v17  ;;  %v4324_v8 = vpop.f32.mrb[17].mxu0 }
 0x530   :  { %4672 = vrot.lane.b32.xlu1 %v4671_v48, %s5067_s17 }
 0x531   :  { %v2865_v53 = vpop.f32.mrb[44].mxu1 }
 0x532   :  { %v4676_v9 = vpack.i.bf16 %v2865_v53, %v2281_v20  ;;  %v4329_v16 = vpop.f32.mrb[45].mxu1 }
 0x534   :  { %4677 = vrot.lane.b32.xlu0 %v4676_v9, %s5075_s14 }
 0x537   :  { %v2938_v58 = vpop.f32.mrb[18].mxu0 }
 0x538   :  { %v4681_v46 = vpack.i.bf16 %v2938_v58, %v2354_v25  ;;  %v4334_v61 = vpop.f32.mrb[19].mxu0 }
 0x539   :  { %v3011_v41 = vpop.f32.mrb[46].mxu1 }
 0x53a   :  { %v4686_v63 = vpack.i.bf16 %v3011_v41, %v2427_v52  ;;  %v4339_v57 = vpop.f32.mrb[47].mxu1  ;;  %4682 = vrot.lane.b32.xlu1 %v4681_v46, %s5074_s7  ;;  %v3365_v41 = vld [vmem:[#allocation16 + $0x8] sm:$0xff] }
 0x53b   :  { %v3367_v57 = vld [vmem:[#allocation16 + $0x18] sm:$0xff] }
 0x53c   :  { %4687 = vrot.lane.b32.xlu0 %v4686_v63, %s5073_s1  ;;  %v3369_v63 = vld [vmem:[#allocation16 + $0x28] sm:$0xff]  ;;  %v4545_v4 = vpack.c.bf16 %v3371_v19, %v3367_v57  ;;  %v3398_v57 = vld [vmem:[#allocation16 + $0x110] sm:$0xff] }
 0x53d   :  { %v4513_v1 = vpack.c.bf16 %v3369_v63, %v3365_v41  ;;  %v3405_v19 = vld [vmem:[#allocation16 + $0x148] sm:$0xff] }
 0x53e   :  { %4546 = vmatprep.subr.bf16.mxu0 %v4545_v4  ;;  %v3407_v4 = vld [vmem:[#allocation16 + $0x158] sm:$0xff]  ;;  %v4533_v5 = vpack.c.bf16 %v3409_v62, %v3405_v19  ;;  %v3591_v19 = vld [vmem:[#allocation17 + $0x8] sm:$0xff] }
 0x53f   :  { %4514 = vmatprep.subr.bf16.mxu1 %v4513_v1  ;;  %v3402_v1 = vld [vmem:[#allocation16 + $0x130] sm:$0xff]  ;;  %v3623_v62 = vld [vmem:[#allocation17 + $0x108] sm:$0xff] }
 0x540   :  { %4516 = vmatpush1.bf16.msra.mxu1 %v4515_v6  ;;  %v4563_v2 = vpack.c.bf16 %v3402_v1, %v3398_v57  ;;  %v3411_v6 = vld [vmem:[#allocation16 + $0x178] sm:$0xff]  ;;  %v3590_v1 = vld [vmem:[#allocation17] sm:$0xff] }
 0x541   :  { %v4565_v7 = vpack.c.bf16 %v3411_v6, %v3407_v4  ;;  %v3608_v4 = vld [vmem:[#allocation17 + $0x90] sm:$0xff] }
 0x566   :  { %v3084_v13 = vpop.f32.mrb[20].mxu0 }
 0x567   :  { %v4691_v34 = vpack.i.bf16 %v3084_v13, %v5756_v31  ;;  %v4344_v40 = vpop.f32.mrb[21].mxu0  ;;  %v3372_v13 = vld [vmem:[#allocation16 + $0x40] sm:$0xff] }
 0x568   :  { %v3374_v40 = vld [vmem:[#allocation16 + $0x50] sm:$0xff] }
 0x569   :  { %4692 = vrot.lane.b32.xlu1 %v4691_v34, %s5071_s9  ;;  %v3376_v34 = vld [vmem:[#allocation16 + $0x60] sm:$0xff] }
 0x56e   :  { %v3157_v33 = vpop.f32.mrb[48].mxu1 }
 0x56f   :  { %v4696_v15 = vpack.i.bf16 %v3157_v33, %v5758_v24  ;;  %v4349_v38 = vpop.f32.mrb[49].mxu1  ;;  %v4519_v33 = vpack.c.bf16 %v3376_v34, %v3372_v13 }
 0x570   :  { %v3381_v38 = vld [vmem:[#allocation16 + $0x88] sm:$0xff] }
 0x571   :  { %4697 = vrot.lane.b32.xlu0 %v4696_v15, %s5072_s28  ;;  %v3378_v15 = vld [vmem:[#allocation16 + $0x70] sm:$0xff] }
 0x59e   :  { %v4668_v47 = vpop.permute.xlu0 %4667 }
 0x59f   :  { %v4670_v20 = vunpack.i.h.bf16 %v4668_v47  ;;  %v4669_v45 = vunpack.i.l.bf16 %v4668_v47  ;;  %v3385_v47 = vld [vmem:[#allocation16 + $0xa8] sm:$0xff] }
 0x5a1   :  { %v3217_v24 = vsel %vm581_vm1, %v5750_v22, %v4669_v45  ;;  %v3218_v37 = vsel %vm581_vm1, %v5760_v59, %v4670_v20  ;;  %v3383_v20 = vld [vmem:[#allocation16 + $0x98] sm:$0xff] }
 0x5a2   :  { %v4673_v17 = vpop.permute.xlu1 %4672  ;;  %v3387_v45 = vld [vmem:[#allocation16 + $0xb8] sm:$0xff] }
 0x5a3   :  { %v4675_v26 = vunpack.i.h.bf16 %v4673_v17  ;;  %v4674_v52 = vunpack.i.l.bf16 %v4673_v17  ;;  %v4551_v17 = vpack.c.bf16 %v3378_v15, %v3374_v40  ;;  %v3415_v40 = vld [vmem:[#allocation16 + $0x198] sm:$0xff]  ;;  %v3412_v15 = vld [vmem:[#allocation16 + $0x180] sm:$0xff] }
 0x5a5   :  { %v3221_v3 = vsel %vm3219_vm5, %v3218_v37, %v4675_v26  ;;  %v3220_v43 = vsel %vm3219_vm5, %v3217_v24, %v4674_v52  ;;  %v4553_v26 = vpack.c.bf16 %v3387_v45, %v3383_v20  ;;  %v3384_v52 = vld [vmem:[#allocation16 + $0xa0] sm:$0xff]  ;;  %v3421_v45 = vld [vmem:[#allocation16 + $0x1c8] sm:$0xff] }
 0x5a6   :  { %v4678_v18 = vpop.permute.xlu0 %4677 }
 0x5a7   :  { %v4680_v30 = vunpack.i.h.bf16 %v4678_v18  ;;  %v4679_v31 = vunpack.i.l.bf16 %v4678_v18  ;;  %v4521_v18 = vpack.c.bf16 %v3385_v47, %v3381_v38  ;;  %v3416_v47 = vld [vmem:[#allocation16 + $0x1a0] sm:$0xff] }
 0x5a8   :  { %v4539_v20 = vpack.c.bf16 %v3416_v47, %v3412_v15  ;;  %v3642_v15 = vld [vmem:[#allocation17 + $0x1a0] sm:$0xff] }
 0x5a9   :  { %v3223_v48 = vsel %vm3222_vm6, %v3220_v43, %v4679_v31  ;;  %v3224_v8 = vsel %vm3222_vm6, %v3221_v3, %v4680_v30  ;;  %v3382_v30 = vld [vmem:[#allocation16 + $0x90] sm:$0xff] }
 0x5aa   :  { %v3386_v31 = vld [vmem:[#allocation16 + $0xb0] sm:$0xff] }
 0x5ac   :  { %v4683_v25 = vpop.permute.xlu1 %4682 }
 0x5ad   :  { %v4685_v50 = vunpack.i.h.bf16 %v4683_v25  ;;  %v4684_v32 = vunpack.i.l.bf16 %v4683_v25  ;;  %v3380_v25 = vld [vmem:[#allocation16 + $0x80] sm:$0xff] }
 0x5ae   :  { %v4688_v36 = vpop.permute.xlu0 %4687 }
 0x5af   :  { %v4690_v53 = vunpack.i.h.bf16 %v4688_v36  ;;  %v4689_v49 = vunpack.i.l.bf16 %v4688_v36  ;;  %v3227_v12 = vsel %vm3225_vm7, %v3224_v8, %v4685_v50  ;;  %v3226_v54 = vsel %vm3225_vm7, %v3223_v48, %v4684_v32 }
 0x5b0   :  { %v4523_v50 = vpack.c.bf16 %v3384_v52, %v3380_v25  ;;  %v4555_v32 = vpack.c.bf16 %v3386_v31, %v3382_v30  ;;  %v3425_v25 = vld [vmem:[#allocation16 + $0x1e8] sm:$0xff]  ;;  %v3427_v31 = vld [vmem:[#allocation16 + $0x1f8] sm:$0xff] }
 0x5b1   :  { %v3230_v22 = vsel %vm3228_vm8, %v3227_v12, %v4690_v53  ;;  %v3229_v59 = vsel %vm3228_vm8, %v3226_v54, %v4689_v49  ;;  %v3389_v53 = vld [vmem:[#allocation16 + $0xc8] sm:$0xff]  ;;  %v3391_v12 = vld [vmem:[#allocation16 + $0xd8] sm:$0xff]  ;;  %v4541_v30 = vpack.c.bf16 %v3425_v25, %v3421_v45 }
 0x5b2   :  { %v3393_v49 = vld [vmem:[#allocation16 + $0xe8] sm:$0xff] }
 0x5b3   :  { %v4525_v54 = vpack.c.bf16 %v3393_v49, %v3389_v53  ;;  %v3607_v53 = vld [vmem:[#allocation17 + $0x88] sm:$0xff]  ;;  %v3638_v49 = vld [vmem:[#allocation17 + $0x180] sm:$0xff] }
 0x5b4   :  { %v3595_v45 = vld [vmem:[#allocation17 + $0x28] sm:$0xff] }
 0x5db   :  { %v4693_v39 = vpop.permute.xlu1 %4692 }
 0x5dc   :  { %v4695_v9 = vunpack.i.h.bf16 %v4693_v39  ;;  %v4694_v16 = vunpack.i.l.bf16 %v4693_v39 }
 0x5de   :  { %v3232_v56 = vsel %vm3231_vm9, %v3229_v59, %v4694_v16  ;;  %v3233_v60 = vsel %vm3231_vm9, %v3230_v22, %v4695_v9  ;;  %v3395_v9 = vld [vmem:[#allocation16 + $0xf8] sm:$0xff]  ;;  %v3388_v16 = vld [vmem:[#allocation16 + $0xc0] sm:$0xff]  ;;  %v3394_v59 = vld [vmem:[#allocation16 + $0xf0] sm:$0xff] }
 0x5df   :  { %v4557_v22 = vpack.c.bf16 %v3395_v9, %v3391_v12 }
 0x5e3   :  { %v4698_v55 = vpop.permute.xlu0 %4697 }
 0x5e4   :  { %v4700_v51 = vunpack.i.h.bf16 %v4698_v55  ;;  %v4699_v21 = vunpack.i.l.bf16 %v4698_v55  ;;  %v3392_v55 = vld [vmem:[#allocation16 + $0xe0] sm:$0xff] }
 0x5e6   :  { %v3235_v29 = vsel %vm3234_vm10, %v3232_v56, %v4699_v21  ;;  %v3236_v58 = vsel %vm3234_vm10, %v3233_v60, %v4700_v51  ;;  %v4527_v51 = vpack.c.bf16 %v3392_v55, %v3388_v16  ;;  %v3390_v21 = vld [vmem:[#allocation16 + $0xd0] sm:$0xff]  ;;  %v3397_v60 = vld [vmem:[#allocation16 + $0x108] sm:$0xff] }
 0x5e7   :  { %4382 = vmatprep.mubr.f32.mxu0 %v3235_v29  ;;  %v4559_v56 = vpack.c.bf16 %v3394_v59, %v3390_v21  ;;  %v3401_v29 = vld [vmem:[#allocation16 + $0x128] sm:$0xff]  ;;  %v3352_v59 = vlaneseq }
 0x5e8   :  { %4383 = vmatmul.mubr.f32.vlgmr.msra.gmra.mrb[22].mxu0 %v3236_v58  ;;  %v3399_v58 = vld [vmem:[#allocation16 + $0x118] sm:$0xff] }
 0x5e9   :  { %3569 = vmatprep.mubr.f32.mxu0 %v5069_v0  ;;  %4548 = vmatpush1.bf16.msra.mxu0 %v4547_v11  ;;  %v3408_v11 = vld [vmem:[#allocation16 + $0x160] sm:$0xff] }
 0x5ea   :  { %4550 = vmatprep.subr.bf16.mxu0 %v4549_v28  ;;  %v3417_v28 = vld [vmem:[#allocation16 + $0x1a8] sm:$0xff] }
 0x5ed   :  { %4552 = vmatpush1.bf16.msra.mxu0 %v4551_v17  ;;  %v3414_v17 = vld [vmem:[#allocation16 + $0x190] sm:$0xff] }
 0x5ee   :  { %4554 = vmatprep.subr.bf16.mxu0 %v4553_v26  ;;  %v3423_v26 = vld [vmem:[#allocation16 + $0x1d8] sm:$0xff] }
 0x5f1   :  { %4556 = vmatpush1.bf16.msra.mxu0 %v4555_v32  ;;  %v3424_v32 = vld [vmem:[#allocation16 + $0x1e0] sm:$0xff] }
 0x5f2   :  { %4558 = vmatprep.subr.bf16.mxu0 %v4557_v22 }
 0x5f5   :  { %4560 = vmatpush1.bf16.msra.mxu0 %v4559_v56 }
 0x6bb   :  { %v4384_v14 = vpop.f32.mrb[22].mxu0 }
 0x6bc   :  { %v3326_v35 = vadd.f32 %v4384_v14, %v5326_v44  ;;  %v3320_v46 = vpop.f32.mrb[23].mxu0  ;;  %v3377_v44 = vld [vmem:[#allocation16 + $0x68] sm:$0xff]  ;;  %v4529_v14 = vpack.c.bf16 %v3401_v29, %v3397_v60  ;;  %v5786_v60 = vshrl.u32 %v3352_v59, 7 }
 0x6bd   :  { %v3321_v61 = vadd.f32 %v3320_v46, %v5320_v42  ;;  %v4517_v42 = vpack.c.bf16 %v3377_v44, %v3373_v10  ;;  %v3396_v46 = vld [vmem:[#allocation16 + $0x100] sm:$0xff]  ;;  %v3406_v44 = vld [vmem:[#allocation16 + $0x150] sm:$0xff] }
 0x6be   :  { %3331 = vadd.xlane.f32.xlu0 %v3326_v35  ;;  %v3404_v10 = vld [vmem:[#allocation16 + $0x140] sm:$0xff]  ;;  %v4567_v13 = vpack.c.bf16 %v3410_v23, %v3406_v44  ;;  %v3354_v29 = vsub.s32 0, %v5786_v60 }
 0x6bf   :  { %3329 = vadd.xlane.f32.xlu1 %v3321_v61  ;;  %4518 = vmatprep.subr.bf16.mxu1 %v4517_v42  ;;  %v4535_v27 = vpack.c.bf16 %v3408_v11, %v3404_v10  ;;  %v3413_v42 = vld [vmem:[#allocation16 + $0x188] sm:$0xff]  ;;  %v3641_v10 = vld [vmem:[#allocation17 + $0x198] sm:$0xff] }
 0x6c0   :  { %4520 = vmatpush1.bf16.msra.mxu1 %v4519_v33  ;;  %v4537_v34 = vpack.c.bf16 %v3417_v28, %v3413_v42  ;;  %v3419_v33 = vld [vmem:[#allocation16 + $0x1b8] sm:$0xff]  ;;  %v3592_v42 = vld [vmem:[#allocation17 + $0x10] sm:$0xff] }
 0x6c1   :  { %4522 = vmatprep.subr.bf16.mxu1 %v4521_v18  ;;  %v4569_v38 = vpack.c.bf16 %v3419_v33, %v3415_v40  ;;  %v3418_v18 = vld [vmem:[#allocation16 + $0x1b0] sm:$0xff]  ;;  %v3610_v40 = vld [vmem:[#allocation17 + $0xa0] sm:$0xff]  ;;  %v3611_v33 = vld [vmem:[#allocation17 + $0xa8] sm:$0xff] }
 0x6c2   :  { %v4571_v52 = vpack.c.bf16 %v3418_v18, %v3414_v17  ;;  %v4585_v25 = vpack.c.bf16 %v3611_v33, %v3610_v40 }
 0x6c4   :  { %4524 = vmatpush1.bf16.msra.mxu1 %v4523_v50  ;;  %v3420_v50 = vld [vmem:[#allocation16 + $0x1c0] sm:$0xff] }
 0x6c5   :  { %4526 = vmatprep.subr.bf16.mxu1 %v4525_v54  ;;  %v3639_v54 = vld [vmem:[#allocation17 + $0x188] sm:$0xff] }
 0x6c6   :  { %v4609_v9 = vpack.c.bf16 %v3639_v54, %v3638_v49  ;;  %v3629_v49 = vld [vmem:[#allocation17 + $0x138] sm:$0xff]  ;;  %v3615_v54 = vld [vmem:[#allocation17 + $0xc8] sm:$0xff] }
 0x6c8   :  { %4528 = vmatpush1.bf16.msra.mxu1 %v4527_v51 }
 0x6c9   :  { %4530 = vmatprep.subr.bf16.mxu1 %v4529_v14  ;;  %v3360_v14 = vsub.s32 1, %v5786_v60 }
 0x74b   :  { %v3332_v36 = vpop.xlane.xlu0 %3331 }
 0x74c   :  { %v3335_v24 = vmul.f32 0.0078125, %v3332_v36  ;;  %v3330_v37 = vpop.xlane.xlu1 %3329  ;;  %v4573_v36 = vpack.c.bf16 %v3427_v31, %v3423_v26  ;;  %v3612_v31 = vld [vmem:[#allocation17 + $0xb0] sm:$0xff] }
 0x74d   :  { %v3334_v39 = vmul.f32 0.0078125, %v3330_v37  ;;  %v3426_v37 = vld [vmem:[#allocation16 + $0x1f0] sm:$0xff] }
 0x74e   :  { %v5778_v3 = vsub.f32 %v3326_v35, %v3335_v24  ;;  %v3403_v35 = vld [vmem:[#allocation16 + $0x138] sm:$0xff]  ;;  %v3422_v24 = vld [vmem:[#allocation16 + $0x1d0] sm:$0xff] }
 0x74f   :  { %v5780_v43 = vsub.f32 %v3321_v61, %v3334_v39  ;;  %v3400_v61 = vld [vmem:[#allocation16 + $0x120] sm:$0xff]  ;;  %v4561_v41 = vpack.c.bf16 %v3403_v35, %v3399_v58  ;;  %v4543_v39 = vpack.c.bf16 %v3424_v32, %v3420_v50  ;;  %v3644_v50 = vld [vmem:[#allocation17 + $0x1b0] sm:$0xff]  ;;  %v3645_v32 = vld [vmem:[#allocation17 + $0x1b8] sm:$0xff] }
 0x750   :  { %v3339_v48 = vmul.f32 %v5778_v3, %v5778_v3  ;;  %v4531_v63 = vpack.c.bf16 %v3400_v61, %v3396_v46  ;;  %v5792_v58 = vld [vmem:[%s5855_s10] sm:$0xf]  ;;  %s5076_s10 = smov [#allocation20]  }
 0x751   :  { %v3338_v8 = vmul.f32 %v5780_v43, %v5780_v43  ;;  %4562 = vmatprep.subr.bf16.mxu0 %v4561_v41  ;;  %v3355_v46 = vrot.slane %v5792_v58, %v3354_v29  ;;  %v3630_v29 = vld [vmem:[#allocation17 + $0x140] sm:$0xff]  ;;  %s3857_s2 = sshll.u32 %s5076_s10, 4  ;;  %s3858_s2 = int_to_ptr.vmem [resolvable:$true] %s3857_s2 }
 0x752   :  { %3342 = vadd.xlane.f32.xlu1 %v3339_v48  ;;  %4532 = vmatpush1.bf16.msra.mxu1 %v4531_v63  ;;  %v4575_v48 = vpack.c.bf16 %v3426_v37, %v3422_v24  ;;  %v3361_v63 = vrot.slane %v5792_v58, %v3360_v14  ;;  %v3596_v37 = vld [vmem:[#allocation17 + $0x30] sm:$0xff]  ;;  %v3631_v14 = vld [vmem:[#allocation17 + $0x148] sm:$0xff]  ;;  %s4993_s29 = scalar_lea.vmem %s3858_s2, 2048  ;;  %p4998_p11 = scmp.lt.s32.totalorder %s3858_s2, %s3858_s2 }
 0x753   :  { %3340 = vadd.xlane.f32.xlu0 %v3338_v8  ;;  %4564 = vmatpush1.bf16.msra.mxu0 %v4563_v2  ;;  %v3606_v8 = vld [vmem:[#allocation17 + $0x80] sm:$0xff]  ;;  %p4994_p10 = scmp.ne.s32.totalorder %s3858_s2, %s4993_s29  ;;  %p4999_p12 = scmp.lt.s32.totalorder %s4993_s29, %s4993_s29 }
 0x754   :  { %4534 = vmatprep.subr.bf16.mxu1 %v4533_v5  ;;  %4566 = vmatprep.subr.bf16.mxu0 %v4565_v7  ;;  %v4577_v12 = vpack.c.bf16 %v3607_v53, %v3606_v8  ;;  %v3622_v2 = vld [vmem:[#allocation17 + $0x100] sm:$0xff]  ;;  %v3609_v5 = vld [vmem:[#allocation17 + $0x98] sm:$0xff]  ;;  %v3640_v7 = vld [vmem:[#allocation17 + $0x190] sm:$0xff]  ;;  %v4621_v8 = vpack.c.bf16 %v3645_v32, %v3644_v50 }
 0x755   :  { %v4611_v23 = vpack.c.bf16 %v3623_v62, %v3622_v2  ;;  %v4581_v28 = vpack.c.bf16 %v3609_v5, %v3608_v4  ;;  %v3628_v53 = vld [vmem:[#allocation17 + $0x130] sm:$0xff]  ;;  %v3618_v5 = vld [vmem:[#allocation17 + $0xe0] sm:$0xff]  ;;  %p5000_p13 = por %p4999_p12, %p4998_p11 }
 0x756   :  { %4536 = vmatpush1.bf16.msra.mxu1 %v4535_v27  ;;  %v4579_v27 = vpack.c.bf16 %v3591_v19, %v3590_v1  ;;  %v3600_v1 = vld [vmem:[#allocation17 + $0x50] sm:$0xff]  ;;  %v3601_v19 = vld [vmem:[#allocation17 + $0x58] sm:$0xff] }
 0x757   :  { %4568 = vmatpush1.bf16.msra.mxu0 %v4567_v13  ;;  %4538 = vmatprep.subr.bf16.mxu1 %v4537_v34  ;;  %v4613_v13 = vpack.c.bf16 %v3641_v10, %v3640_v7  ;;  %v3624_v34 = vld [vmem:[#allocation17 + $0x110] sm:$0xff]  ;;  %v3619_v7 = vld [vmem:[#allocation17 + $0xe8] sm:$0xff]  ;;  %v3650_v10 = vld [vmem:[#allocation17 + $0x1e0] sm:$0xff]  ;;  %p5001_p0 = pnand %p5000_p13, %p4994_p10 }
 0x758   :  { %4570 = vmatprep.subr.bf16.mxu0 %v4569_v38  ;;  %v3643_v38 = vld [vmem:[#allocation17 + $0x1a8] sm:$0xff]  ;;  %v3632_v4 = vld [vmem:[#allocation17 + $0x150] sm:$0xff] }
 0x759   :  { %v4617_v26 = vpack.c.bf16 %v3643_v38, %v3642_v15  ;;  %v3620_v15 = vld [vmem:[#allocation17 + $0xf0] sm:$0xff]  ;;  %v3621_v38 = vld [vmem:[#allocation17 + $0xf8] sm:$0xff] }
 0x75a   :  { %4540 = vmatpush1.bf16.msra.mxu1 %v4539_v20  ;;  %v3594_v20 = vld [vmem:[#allocation17 + $0x20] sm:$0xff] }
 0x75b   :  { %4572 = vmatpush1.bf16.msra.mxu0 %v4571_v52  ;;  %4542 = vmatprep.subr.bf16.mxu1 %v4541_v30  ;;  %v3626_v52 = vld [vmem:[#allocation17 + $0x120] sm:$0xff]  ;;  %v3627_v30 = vld [vmem:[#allocation17 + $0x128] sm:$0xff] }
 0x75c   :  { %4574 = vmatprep.subr.bf16.mxu0 %v4573_v36  ;;  %v4587_v36 = vpack.c.bf16 %v3595_v45, %v3594_v20  ;;  %v4619_v24 = vpack.c.bf16 %v3627_v30, %v3626_v52  ;;  %v3653_v20 = vld [vmem:[#allocation17 + $0x1f8] sm:$0xff]  ;;  %v3604_v45 = vld [vmem:[#allocation17 + $0x70] sm:$0xff] }
 0x75d   :  { %v3636_v30 = vld [vmem:[#allocation17 + $0x170] sm:$0xff] }
 0x75e   :  { %4544 = vmatpush1.bf16.msra.mxu1 %v4543_v39  ;;  %v3597_v39 = vld [vmem:[#allocation17 + $0x38] sm:$0xff] }
 0x75f   :  { %4576 = vmatpush1.bf16.msra.mxu0 %v4575_v48  ;;  %4578 = vmatprep.subr.bf16.mxu1 %v4577_v12  ;;  %v3614_v12 = vld [vmem:[#allocation17 + $0xc0] sm:$0xff] }
 0x760   :  { %4610 = vmatprep.subr.bf16.mxu0 %v4609_v9  ;;  %v3646_v9 = vld [vmem:[#allocation17 + $0x1c0] sm:$0xff]  ;;  %v4593_v59 = vpack.c.bf16 %v3615_v54, %v3614_v12 }
 0x7df   :  { %v3343_v16 = vpop.xlane.xlu1 %3342 }
 0x7e0   :  { %v3345_v55 = vmul.f32 0.0078125, %v3343_v16  ;;  %v3341_v22 = vpop.xlane.xlu0 %3340  ;;  %v3647_v16 = vld [vmem:[#allocation17 + $0x1c8] sm:$0xff] }
 0x7e1   :  { %v3344_v51 = vmul.f32 0.0078125, %v3341_v22  ;;  %v4623_v22 = vpack.c.bf16 %v3629_v49, %v3628_v53 }
 0x7e2   :  { %v3347_v21 = vadd.f32 1e-05, %v3345_v55  ;;  %v4591_v55 = vpack.c.bf16 %v3597_v39, %v3596_v37 }
 0x7e3   :  { %v3346_v56 = vadd.f32 1e-05, %v3344_v51  ;;  %v3598_v51 = vld [vmem:[#allocation17 + $0x40] sm:$0xff] }
 0x7e4   :  { %4765 = vrsqrt.f32 %v3347_v21  ;;  %v3599_v21 = vld [vmem:[#allocation17 + $0x48] sm:$0xff] }
 0x7e5   :  { %4767 = vrsqrt.f32 %v3346_v56  ;;  %v4625_v56 = vpack.c.bf16 %v3647_v16, %v3646_v9 }
 0x7ee   :  { %v4766_v35 = vpop.eup %4765 }
 0x7ef   :  { %v4768_v61 = vpop.eup %4767  ;;  %v3351_v57 = vmul.f32 %v4766_v35, %v5778_v3  ;;  %v3625_v3 = vld [vmem:[#allocation17 + $0x118] sm:$0xff]  ;;  %v3616_v35 = vld [vmem:[#allocation17 + $0xd0] sm:$0xff] }
 0x7f0   :  { %v3350_v41 = vmul.f32 %v4768_v61, %v5780_v43  ;;  %v3593_v43 = vld [vmem:[#allocation17 + $0x18] sm:$0xff]  ;;  %v4615_v18 = vpack.c.bf16 %v3625_v3, %v3624_v34  ;;  %v3648_v61 = vld [vmem:[#allocation17 + $0x1d0] sm:$0xff]  ;;  %v3634_v34 = vld [vmem:[#allocation17 + $0x160] sm:$0xff] }
 0x7f1   :  { %v3357_v44 = vmul.f32 %v3355_v46, %v3351_v57  ;;  %v4583_v17 = vpack.c.bf16 %v3593_v43, %v3592_v42  ;;  %v4627_v57 = vpack.c.bf16 %v3631_v14, %v3630_v29  ;;  %v3602_v42 = vld [vmem:[#allocation17 + $0x60] sm:$0xff]  ;;  %v4601_v43 = vpack.c.bf16 %v3619_v7, %v3618_v5  ;;  %v3635_v3 = vld [vmem:[#allocation17 + $0x168] sm:$0xff] }
 0x7f2   :  { %v3356_v6 = vmul.f32 %v3355_v46, %v3350_v41  ;;  %v3617_v46 = vld [vmem:[#allocation17 + $0xd8] sm:$0xff]  ;;  %v4635_v33 = vpack.c.bf16 %v3635_v3, %v3634_v34 }
 0x7f3   :  { %v5805_v47 = vadd.f32 %v3361_v63, %v3357_v44  ;;  %v3649_v41 = vld [vmem:[#allocation17 + $0x1d8] sm:$0xff]  ;;  %v4597_v2 = vpack.c.bf16 %v3617_v46, %v3616_v35  ;;  %v3651_v44 = vld [vmem:[#allocation17 + $0x1e8] sm:$0xff] }
 0x7f4   :  { %v5799_v11 = vadd.f32 %v3361_v63, %v3356_v6  ;;  %v4595_v63 = vpack.c.bf16 %v3599_v21, %v3598_v51  ;;  %v4629_v62 = vpack.c.bf16 %v3649_v41, %v3648_v61  ;;  %v3633_v6 = vld [vmem:[#allocation17 + $0x158] sm:$0xff] }
 0x7f6   :  { %3493 = vmatmul.mubr.f32.vlgmr.msra.gmra.mrb[50].mxu1 %v5799_v11  ;;  %3570 = vmatmul.mubr.f32.vlgmr.msra.gmra.mrb[24].mxu0 %v5799_v11 }
 0x7f7   :  { %3498 = vmatprep.mubr.f32.mxu1 %v5069_v0  ;;  %3575 = vmatprep.mubr.f32.mxu0 %v5069_v0  ;;  %v3613_v0 = vld [vmem:[#allocation17 + $0xb8] sm:$0xff] }
 0x7f8   :  { %4580 = vmatpush3.bf16.msra.mxu1 %v4579_v27  ;;  %4612 = vmatpush3.bf16.msra.mxu0 %v4611_v23  ;;  %v4589_v48 = vpack.c.bf16 %v3613_v0, %v3612_v31  ;;  %v4599_v27 = vpack.c.bf16 %v3601_v19, %v3600_v1  ;;  %v4631_v23 = vpack.c.bf16 %v3633_v6, %v3632_v4  ;;  %v3637_v31 = vld [vmem:[#allocation17 + $0x178] sm:$0xff] }
 0x7f9   :  { %4582 = vmatprep.subr.bf16.mxu1 %v4581_v28  ;;  %4614 = vmatprep.subr.bf16.mxu0 %v4613_v13  ;;  %v4633_v28 = vpack.c.bf16 %v3651_v44, %v3650_v10  ;;  %v3603_v13 = vld [vmem:[#allocation17 + $0x68] sm:$0xff]  ;;  %v4639_v0 = vpack.c.bf16 %v3637_v31, %v3636_v30 }
 0x7fa   :  { %3499 = vmatmul.mubr.f32.gmra.mrb[52].mxu1 %v5805_v47  ;;  %3576 = vmatmul.mubr.f32.gmra.mrb[26].mxu0 %v5805_v47  ;;  %v4603_v40 = vpack.c.bf16 %v3603_v13, %v3602_v42 }
 0x7fc   :  { %4584 = vmatpush3.bf16.msra.mxu1 %v4583_v17  ;;  %4616 = vmatpush3.bf16.msra.mxu0 %v4615_v18  ;;  %v3652_v17 = vld [vmem:[#allocation17 + $0x1f0] sm:$0xff]  ;;  %v4605_v18 = vpack.c.bf16 %v3621_v38, %v3620_v15 }
 0x7fd   :  { %4586 = vmatprep.subr.bf16.mxu1 %v4585_v25  ;;  %4618 = vmatprep.subr.bf16.mxu0 %v4617_v26  ;;  %v3605_v25 = vld [vmem:[#allocation17 + $0x78] sm:$0xff]  ;;  %v4637_v26 = vpack.c.bf16 %v3653_v20, %v3652_v17 }
 0x7fe   :  { %v4607_v52 = vpack.c.bf16 %v3605_v25, %v3604_v45 }
 0x800   :  { %4588 = vmatpush3.bf16.msra.mxu1 %v4587_v36  ;;  %4620 = vmatpush3.bf16.msra.mxu0 %v4619_v24 }
 0x801   :  { %4590 = vmatprep.subr.bf16.mxu1 %v4589_v48  ;;  %4622 = vmatprep.subr.bf16.mxu0 %v4621_v8 }
 0x804   :  { %4592 = vmatpush3.bf16.msra.mxu1 %v4591_v55  ;;  %4624 = vmatpush3.bf16.msra.mxu0 %v4623_v22 }
 0x805   :  { %4594 = vmatprep.subr.bf16.mxu1 %v4593_v59  ;;  %4626 = vmatprep.subr.bf16.mxu0 %v4625_v56 }
 0x808   :  { %4596 = vmatpush3.bf16.msra.mxu1 %v4595_v63  ;;  %4628 = vmatpush3.bf16.msra.mxu0 %v4627_v57 }
 0x809   :  { %4598 = vmatprep.subr.bf16.mxu1 %v4597_v2  ;;  %4630 = vmatprep.subr.bf16.mxu0 %v4629_v62 }
 0x80c   :  { %4600 = vmatpush3.bf16.msra.mxu1 %v4599_v27  ;;  %4632 = vmatpush3.bf16.msra.mxu0 %v4631_v23 }
 0x80d   :  { %4602 = vmatprep.subr.bf16.mxu1 %v4601_v43  ;;  %4634 = vmatprep.subr.bf16.mxu0 %v4633_v28 }
 0x810   :  { %4604 = vmatpush3.bf16.msra.mxu1 %v4603_v40  ;;  %4636 = vmatpush3.bf16.msra.mxu0 %v4635_v33 }
 0x811   :  { %4606 = vmatprep.subr.bf16.mxu1 %v4605_v18  ;;  %4638 = vmatprep.subr.bf16.mxu0 %v4637_v26 }
 0x814   :  { %4608 = vmatpush3.bf16.msra.mxu1 %v4607_v52  ;;  %4640 = vmatpush3.bf16.msra.mxu0 %v4639_v0 }
 0x8c9   :  { %v3494_v50 = vpop.f32.mrb[50].mxu1  ;;  %v3571_v32 = vpop.f32.mrb[24].mxu0 }
 0x8ca   :  { %v3496_v36 = vpop.f32.mrb[51].mxu1  ;;  %v3573_v24 = vpop.f32.mrb[25].mxu0  ;;  %v3582_v48 = vmax.f32 %v3494_v50, 0.0  ;;  %v3584_v8 = vmax.f32 %v3571_v32, 0.0 }
 0x8cb   :  { %v3583_v37 = vmax.f32 %v3496_v36, 0.0  ;;  %v3585_v39 = vmax.f32 %v3573_v24, 0.0 }
 0x8cd   :  { %v3500_v53 = vpop.f32.mrb[52].mxu1  ;;  %v3577_v49 = vpop.f32.mrb[26].mxu0  ;;  %3718 = vmatprep.mubr.f32.mxu1 %v3583_v37  ;;  %3793 = vmatprep.mubr.f32.mxu0 %v3585_v39 }
 0x8ce   :  { %v3502_v12 = vpop.f32.mrb[53].mxu1  ;;  %v3579_v54 = vpop.f32.mrb[27].mxu0  ;;  %3719 = vmatmul.mubr.f32.vlgmr.msra.gmra.mrb[54].mxu1 %v3582_v48  ;;  %3794 = vmatmul.mubr.f32.vlgmr.msra.gmra.mrb[28].mxu0 %v3584_v8  ;;  %v3586_v55 = vmax.f32 %v3500_v53, 0.0  ;;  %v3588_v22 = vmax.f32 %v3577_v49, 0.0 }
 0x8cf   :  { %v3587_v9 = vmax.f32 %v3502_v12, 0.0  ;;  %v3589_v16 = vmax.f32 %v3579_v54, 0.0 }
 0x8d1   :  { %3723 = vmatprep.mubr.f32.mxu1 %v3587_v9  ;;  %3798 = vmatprep.mubr.f32.mxu0 %v3589_v16 }
 0x8d2   :  { %3724 = vmatmul.mubr.f32.gmra.mrb[56].mxu1 %v3586_v55  ;;  %3799 = vmatmul.mubr.f32.gmra.mrb[30].mxu0 %v3588_v22 }
 0x9a1   :  { %v4076_v51 = vpop.f32.mrb[54].mxu1  ;;  %v4114_v21 = vpop.f32.mrb[28].mxu0 }
 0x9a2   :  { %v4077_v59 = vpop.f32.mrb[55].mxu1  ;;  %v4115_v56 = vpop.f32.mrb[29].mxu0 }
 0x9a3   :  { %v4078_v29 = vadd.f32 %v4077_v59, %v4076_v51  ;;  %v4116_v14 = vadd.f32 %v4115_v56, %v4114_v21 }
 0x9a5   :  { %v3721_v35 = vadd.f32 %v4078_v29, %v5799_v11  ;;  %v4079_v46 = vpop.f32.mrb[56].mxu1  ;;  %v4117_v61 = vpop.f32.mrb[30].mxu0 }
 0x9a6   :  { %v4080_v41 = vpop.f32.mrb[57].mxu1  ;;  %v4118_v63 = vpop.f32.mrb[31].mxu0 }
 0x9a7   :  { %v4081_v57 = vadd.f32 %v4080_v41, %v4079_v46  ;;  %v4119_v1 = vadd.f32 %v4118_v63, %v4117_v61  ;;  %v3796_v19 = vadd.f32 %v4116_v14, %v3721_v35 }
 0x9a9   :  { %v3726_v2 = vadd.f32 %v4081_v57, %v5805_v47  ;;  %3804 = vadd.xlane.f32.xlu0 %v3796_v19 }
 0x9ab   :  { %v3801_v62 = vadd.f32 %v4119_v1, %v3726_v2 }
 0x9ad   :  { %3806 = vadd.xlane.f32.xlu1 %v3801_v62 }
 0xa36   :  { %v3805_v4 = vpop.xlane.xlu0 %3804 }
 0xa37   :  { %v3808_v6 = vmul.f32 0.0078125, %v3805_v4 }
 0xa39   :  { %v3810_v5 = vsub.f32 %v3796_v19, %v3808_v6 }
 0xa3a   :  { %v3807_v7 = vpop.xlane.xlu1 %3806 }
 0xa3b   :  { %v3809_v10 = vmul.f32 0.0078125, %v3807_v7  ;;  %v3812_v44 = vmul.f32 %v3810_v5, %v3810_v5 }
 0xa3d   :  { %v3811_v27 = vsub.f32 %v3801_v62, %v3809_v10  ;;  %3814 = vadd.xlane.f32.xlu0 %v3812_v44 }
 0xa3f   :  { %v3813_v11 = vmul.f32 %v3811_v27, %v3811_v27 }
 0xa41   :  { %3816 = vadd.xlane.f32.xlu1 %v3813_v11 }
 0xa42   :  { %5004 = shalt.err (!%p5001_p0)
}
 0xa43   :  { %s5005_s17 = scalar_lea.hbm %s5857_s12, 2048 }
 0xa44   :  { %p5006_p1 = scmp.ne.s32.totalorder %s5857_s12, %s5005_s17  ;;  %p5009_p2 = scmp.lt.u32.totalorder %s5005_s17, %s5857_s12 }
 0xa46   :  { %p5011_p3 = pnand %p5009_p2, %p5006_p1 }
 0xa48   :  { %5014 = shalt.err (!%p5011_p3)
}
 0xa49   :  { %3863 = dma.vmem_to_hbm [thread:$0]  %s3858_s2, 2048, %s5857_s12, [#allocation21], %s5055_s15, %s5055_s15, %s5056_s16   ;;  %v3828_v34 = vsub.s32 2, %v5786_v60  ;;  %v3834_v3 = vsub.s32 3, %v5786_v60 }
 0xa4a   :  { %s5077_s12 = smov [#allocation19]  }
 0xa4b   :  { %v3829_v40 = vrot.slane %v5792_v58, %v3828_v34  ;;  %v3835_v38 = vrot.slane %v5792_v58, %v3834_v3  ;;  %s3845_s25 = sshll.u32 %s5077_s12, 4  ;;  %s3846_s25 = int_to_ptr.vmem [resolvable:$true] %s3845_s25 }
 0xa4c   :  { %s5015_s24 = scalar_lea.vmem %s3846_s25, 256  ;;  %p5020_p5 = scmp.lt.s32.totalorder %s3846_s25, %s3846_s25 }
 0xa4d   :  { %p5016_p4 = scmp.ne.s32.totalorder %s3846_s25, %s5015_s24  ;;  %p5021_p6 = scmp.lt.s32.totalorder %s5015_s24, %s5015_s24 }
 0xa4f   :  { %p5022_p7 = por %p5021_p6, %p5020_p5 }
 0xa51   :  { %p5023_p8 = pnand %p5022_p7, %p5016_p4 }
 0xaca   :  { %v3815_v47 = vpop.xlane.xlu0 %3814 }
 0xacb   :  { %v3818_v23 = vmul.f32 0.0078125, %v3815_v47 }
 0xacd   :  { %v3820_v42 = vadd.f32 1e-05, %v3818_v23 }
 0xace   :  { %v3817_v43 = vpop.xlane.xlu1 %3816 }
 0xacf   :  { %4769 = vrsqrt.f32 %v3820_v42  ;;  %v3819_v28 = vmul.f32 0.0078125, %v3817_v43 }
 0xad1   :  { %v3821_v13 = vadd.f32 1e-05, %v3819_v28 }
 0xad3   :  { %4771 = vrsqrt.f32 %v3821_v13 }
 0xad9   :  { %v4770_v33 = vpop.eup %4769 }
 0xada   :  { %v3824_v15 = vmul.f32 %v4770_v33, %v3810_v5 }
 0xadc   :  { %v3830_v17 = vmul.f32 %v3829_v40, %v3824_v15 }
 0xadd   :  { %v4772_v18 = vpop.eup %4771 }
 0xade   :  { %v3825_v20 = vmul.f32 %v4772_v18, %v3811_v27  ;;  %v3836_v45 = vadd.f32 %v3835_v38, %v3830_v17 }
 0xae0   :  { %v3831_v25 = vmul.f32 %v3829_v40, %v3825_v20  ;;  %3838 = vst [vmem:[#allocation19] sm:$0xff] %v3836_v45 }
 0xae2   :  { %v3837_v26 = vadd.f32 %v3835_v38, %v3831_v25 }
 0xae4   :  { %3839 = vst [vmem:[#allocation19 + $0x8] sm:$0xff] %v3837_v26 }
 0xae5   :  { %5026 = shalt.err (!%p5023_p8)
}
 0xae6   :  { %s5027_s3 = scalar_lea.hbm %s5856_s11, 256 }
 0xae7   :  { %p5028_p9 = scmp.ne.s32.totalorder %s5856_s11, %s5027_s3  ;;  %p5031_p10 = scmp.lt.u32.totalorder %s5027_s3, %s5856_s11 }
 0xae9   :  { %p5033_p11 = pnand %p5031_p10, %p5028_p9 }
 0xaeb   :  { %5036 = shalt.err (!%p5033_p11)
}
 0xaec   :  { %3851 = dma.vmem_to_hbm [thread:$0]  %s3846_s25, 256, %s5856_s11, [#allocation4], %s5055_s15, %s5055_s15, %s5056_s16  }
 0xaed   :  { %5049 = dma.done.wait [#allocation4], 256  }
 0xaee   :  { %5050 = vsyncadd [#allocation4], 4294967040 }
 0xaef   :  { %5051 = dma.done.wait [#allocation21], 2048  }
 0xaf0   :  { %5052 = vsyncadd [#allocation21], 4294965248 }
 0xaf1   :  { %3870 = vsyncpa [#allocation3], 1 }
 0xaf2   :  { %3871 = vsyncpa [#allocation6], 1 }
 0xaf3   :  { %3872 = vsyncpa [#allocation9], 1 }
 0xaf4   :  { %3873 = vsyncpa [#allocation12], 1 }
 0xaf5   :  { %3874 = vsyncpa [#allocation15], 1 }
 0xaf6   :  { %3875 = vsyncpa [#allocation18], 1 }
 0xaf7   :  { %3876 = vsyncpa [#allocation4], 1 }
 0xaf8   :  { %3877 = vsyncpa [#allocation21], 1 }

</bundles_post_ra>
